<compile_context>
chip_gen: v6e
topology: v6e:2x2x1
jax: 0.10.0
libtpu: 0.0.40
codegen_flags: <defaults>
</compile_context>

<pallas_src>
import jax
import jax.numpy as jnp
from jax import lax
from jax.experimental import pallas as pl
from jax.experimental.pallas import tpu as pltpu
import numpy as np

BN_EPS = 1e-5
_HALO = 8            # halo block height (sublane-aligned)
_MAX_UNROLL_CH = 32  # above this, fall back (see TODO below)


# ----------------------------------------------------------------------------- kernel
def _make_kernel(*, Cin, Cout, TH, W, pad, dil, has_halo, n_row_blocks,
                 residual, out_dtype):
    THp = TH + 2 * pad
    Wp = W + 2 * pad
    f32 = jnp.float32

    def kernel(*refs):
        if has_halo:
            (x_ref, top_ref, bot_ref, dw_ref, pw_ref, b_ref, out_ref, xpad) = refs
        else:
            (x_ref, dw_ref, pw_ref, b_ref, out_ref, xpad) = refs
            top_ref = bot_ref = None
        r = pl.program_id(1)

        # ---- assemble the zero-padded input tile in VMEM (halo handled here,
        #      nothing is padded in HBM) -----------------------------------------
        xpad[:, :, 0:pad] = jnp.zeros((Cin, THp, pad), f32)
        xpad[:, :, pad + W:Wp] = jnp.zeros((Cin, THp, pad), f32)
        xpad[:, 0:pad, :] = jnp.zeros((Cin, pad, Wp), f32)
        xpad[:, THp - pad:THp, :] = jnp.zeros((Cin, pad, Wp), f32)
        xpad[:, pad:pad + TH, pad:pad + W] = x_ref[0].astype(f32)

        if has_halo:
            @pl.when(r > 0)  # top halo rows come from the previous row block
            def _():
                xpad[:, 0:pad, pad:pad + W] = \
                    top_ref[0, :, _HALO - pad:_HALO, :].astype(f32)

            @pl.when(r < n_row_blocks - 1)  # bottom halo rows from the next block
            def _():
                xpad[:, THp - pad:THp, pad:pad + W] = \
                    bot_ref[0, :, 0:pad, :].astype(f32)

        # ---- fused depthwise 3x3 + pointwise 1x1 (BN folded) on the VPU --------
        # Per-channel scalars live in SMEM; every FMA works on a lane-dense (TH, W)
        # slab read directly from the padded scratch ref.
        acc = [None] * Cout
        for ci in range(Cin):
            dwc = None
            for k in range(9):
                kh, kw = divmod(k, 3)
                patch = xpad[ci, kh * dil:kh * dil + TH, kw * dil:kw * dil + W]
                term = patch * dw_ref[ci * 9 + k]
                dwc = term if dwc is None else dwc + term
            for co in range(Cout):
                contrib = dwc * pw_ref[ci * Cout + co]
                acc[co] = contrib if acc[co] is None else acc[co] + contrib

        # ---- bias (BN folded) + residual + ReLU + store -------------------------
        for co in range(Cout):
            y = acc[co] + b_ref[co]
            if residual:
                y = y + x_ref[0, co].astype(f32)
            out_ref[0, co] = jnp.maximum(y, 0.0).astype(out_dtype)

    return kernel


# ----------------------------------------------------------------------------- tiling
def _vmem_estimate(th, *, Cin, Cout, W, pad, halo, in_bytes):
    thp, wp = th + 2 * pad, W + 2 * pad
    est = 2 * Cin * th * W * in_bytes                 # main input block (double-buffered)
    if halo:
        est += 2 * 2 * Cin * _HALO * W * in_bytes     # top/bottom halo blocks
    est += 2 * Cout * th * W * in_bytes               # output block (double-buffered)
    est += Cin * thp * wp * 4                         # zero-padded f32 scratch
    est += (Cout + 4) * th * W * 4                    # live f32 accumulators
    return est


def _pick_row_block(H, W, Cin, Cout, pad, in_bytes, requested,
                    target_rows=128, budget_bytes=24 * 1024 * 1024):
    def ok(th):
        return (th < H and H % th == 0 and th % _HALO == 0
                and th >= pad and pad <= _HALO)

    if requested is not None:
        return requested if (requested < H and ok(requested)) else H
    if H <= target_rows:
        return H
    cands = sorted((t for t in range(_HALO, target_rows + 1, _HALO) if ok(t)),
                   reverse=True)
    for t in cands:
        if _vmem_estimate(t, Cin=Cin, Cout=Cout, W=W, pad=pad, halo=True,
                          in_bytes=in_bytes) <= budget_bytes:
            return t
    return cands[-1] if cands else H


# ----------------------------------------------------------------------------- wrapper
def depthwise_separable_conv(x, params, *, stride=1, dilation=1, row_block=None):
    """Forward pass matching the PyTorch DepthwiseSeparableConv (eval-mode BN).

    x: (N, Cin, H, W).  params use the torch layouts:
      dw_w (Cin,1,3,3), dw_b (Cin,), pw_w (Cout,Cin,1,1), pw_b (Cout,),
      bn_gamma/bn_beta/bn_mean/bn_var (Cout,).
    """
    N, Cin, H, W = x.shape
    Cout = params["pw_w"].shape[0]
    pad = dilation

    if stride != 1 or Cin > _MAX_UNROLL_CH or Cout > _MAX_UNROLL_CH:
        # TODO(synk): strided / wide-channel configs would need a channels-last MXU
        # Pallas variant; they take the XLA reference path for now.
        return _reference_forward(x, params, stride=stride, dilation=dilation)

    residual = (Cin == Cout)      # stride == 1 on this path
    Ho, Wo = H, W                 # padding == dilation keeps spatial size at stride 1
    f32 = jnp.float32

    # ---- fold BatchNorm + both conv biases into the pointwise weights/bias -----
    dw_flat = params["dw_w"].astype(f32).reshape(Cin, 9).reshape(-1)      # (Cin*9,)
    dw_b = params["dw_b"].astype(f32)
    pw_w = params["pw_w"].astype(f32)[:, :, 0, 0]                         # (Cout, Cin)
    scale = params["bn_gamma"].astype(f32) * lax.rsqrt(params["bn_var"].astype(f32) + BN_EPS)
    pw_eff = (pw_w * scale[:, None]).T                                    # (Cin, Cout)
    bias_eff = (params["bn_beta"].astype(f32)
                + (params["pw_b"].astype(f32) - params["bn_mean"].astype(f32)) * scale
                + dw_b @ pw_eff)                                          # (Cout,)
    pw_flat = pw_eff.reshape(-1)                                          # (Cin*Cout,)

    # ---- spatial row tiling (halo of `dilation` rows, fetched as 8-row blocks) --
    in_bytes = x.dtype.itemsize
    TH = _pick_row_block(H, W, Cin, Cout, pad, in_bytes, row_block)
    nR = H // TH
    has_halo = nR > 1
    est = _vmem_estimate(TH, Cin=Cin, Cout=Cout, W=W, pad=pad,
                         halo=has_halo, in_bytes=in_bytes)
    vmem_limit = int(min(64 * 2**20, max(32 * 2**20, 2 * est)))

    in_specs = [pl.BlockSpec((1, Cin, TH, W), lambda n, r: (n, 0, r, 0))]
    inputs = [x]
    if has_halo:
        bpt = TH // _HALO            # halo blocks per row tile
        n_hb = H // _HALO            # total halo blocks along H
        in_specs.append(pl.BlockSpec(
            (1, Cin, _HALO, W),
            lambda n, r: (n, 0, jnp.maximum(r * bpt - 1, 0), 0)))
        in_specs.append(pl.BlockSpec(
            (1, Cin, _HALO, W),
            lambda n, r: (n, 0, jnp.minimum((r + 1) * bpt, n_hb - 1), 0)))
        inputs += [x, x]

    smem = pl.BlockSpec(memory_space=pltpu.MemorySpace.SMEM)
    in_specs += [smem, smem, smem]
    inputs += [dw_flat, pw_flat, bias_eff]

    kernel = _make_kernel(Cin=Cin, Cout=Cout, TH=TH, W=W, pad=pad, dil=dilation,
                          has_halo=has_halo, n_row_blocks=nR, residual=residual,
                          out_dtype=jnp.dtype(x.dtype))

    return pl.pallas_call(
        kernel,
        out_shape=jax.ShapeDtypeStruct((N, Cout, Ho, Wo), x.dtype),
        grid_spec=pltpu.PrefetchScalarGridSpec(
            num_scalar_prefetch=0,
            grid=(N, nR),
            in_specs=in_specs,
            out_specs=pl.BlockSpec((1, Cout, TH, Wo), lambda n, r: (n, 0, r, 0)),
            scratch_shapes=[pltpu.VMEM((Cin, TH + 2 * pad, W + 2 * pad), jnp.float32)]),
        compiler_params=pltpu.CompilerParams(
            dimension_semantics=("parallel", "parallel"),
            vmem_limit_bytes=vmem_limit),
    )(*inputs)


# ----------------------------------------------------------------------------- reference
def _reference_forward(x, params, *, stride=1, dilation=1):
    """Pure-JAX reference (NCHW, torch weight layouts)."""
    Cin = x.shape[1]
    Cout = params["pw_w"].shape[0]
    dw = lax.conv_general_dilated(
        x, params["dw_w"], window_strides=(stride, stride),
        padding=[(dilation, dilation), (dilation, dilation)],
        rhs_dilation=(dilation, dilation),
        dimension_numbers=("NCHW", "OIHW", "NCHW"),
        feature_group_count=Cin) + params["dw_b"].reshape(1, Cin, 1, 1)
    pw = lax.conv_general_dilated(
        dw, params["pw_w"], window_strides=(1, 1), padding="VALID",
        dimension_numbers=("NCHW", "OIHW", "NCHW")) + params["pw_b"].reshape(1, Cout, 1, 1)
    scale = params["bn_gamma"] * lax.rsqrt(params["bn_var"] + BN_EPS)
    y = pw * scale.reshape(1, Cout, 1, 1) + \
        (params["bn_beta"] - params["bn_mean"] * scale).reshape(1, Cout, 1, 1)
    if Cin == Cout and stride == 1:
        y = y + x
    return jnp.maximum(y, 0.0)


# ----------------------------------------------------------------------------- test
if __name__ == "__main__":
    # TODO(synk): training-mode BatchNorm (batch statistics over N,H,W) would need a
    # cross-program reduction; inference-mode running-stats BN is implemented instead.
    N, Cin, Cout, H, W = 2, 4, 4, 16, 16

    key = jax.random.PRNGKey(0)
    ks = jax.random.split(key, 9)
    x = jax.random.normal(ks[0], (N, Cin, H, W), jnp.float32)
    params = {
        "dw_w": 0.2 * jax.random.normal(ks[1], (Cin, 1, 3, 3), jnp.float32),
        "dw_b": 0.1 * jax.random.normal(ks[2], (Cin,), jnp.float32),
        "pw_w": 0.2 * jax.random.normal(ks[3], (Cout, Cin, 1, 1), jnp.float32),
        "pw_b": 0.1 * jax.random.normal(ks[4], (Cout,), jnp.float32),
        "bn_gamma": 1.0 + 0.1 * jax.random.normal(ks[5], (Cout,), jnp.float32),
        "bn_beta": 0.1 * jax.random.normal(ks[6], (Cout,), jnp.float32),
        "bn_mean": 0.1 * jax.random.normal(ks[7], (Cout,), jnp.float32),
        "bn_var": jnp.abs(1.0 + 0.1 * jax.random.normal(ks[8], (Cout,), jnp.float32)),
    }

    configs = [
        dict(dilation=1, row_block=None),  # single row block per image
        dict(dilation=1, row_block=8),     # 2 row blocks -> exercises the halo path
        dict(dilation=2, row_block=8),     # dilated taps + 2-row halo
    ]
    for cfg in configs:
        out = jax.block_until_ready(
            depthwise_separable_conv(x, params, stride=1, **cfg))
        ref = jax.block_until_ready(
            _reference_forward(x, params, stride=1, dilation=cfg["dilation"]))
        np.testing.assert_allclose(np.asarray(out), np.asarray(ref),
                                   rtol=1e-4, atol=1e-5)

    print("KERNEL_OK")
</pallas_src>

<mosaic_0001>
module attributes {stable_mosaic.version = 11 : i64} {
  func.func @kernel(%arg0: i32, %arg1: i32, %arg2: memref<1x4x16x16xf32, #tpu.memory_space<vmem>>, %arg3: memref<36xf32, #tpu.memory_space<smem>>, %arg4: memref<16xf32, #tpu.memory_space<smem>>, %arg5: memref<4xf32, #tpu.memory_space<smem>>, %arg6: memref<1x4x16x16xf32, #tpu.memory_space<vmem>>, %arg7: memref<4x18x18xf32, #tpu.memory_space<vmem>>) attributes {dimension_semantics = [#tpu.dimension_semantics<parallel>, #tpu.dimension_semantics<parallel>], iteration_bounds = array<i64: 2, 1>, scalar_prefetch = 0 : i64, scratch_operands = 1 : i64, tpu.core_type = #tpu.core_type<tc>, window_params = [{transform_indices = @transform_0, window_bounds = array<i64: 1, 4, 16, 16>}, {transform_indices = @transform_1, window_bounds = array<i64: 36>}, {transform_indices = @transform_2, window_bounds = array<i64: 16>}, {transform_indices = @transform_3, window_bounds = array<i64: 4>}, {transform_indices = @transform_4, window_bounds = array<i64: 1, 4, 16, 16>}]} {
    %cst = arith.constant 0.000000e+00 : f32
    %0 = vector.broadcast %cst : f32 to vector<4x18x1xf32>
    %c0 = arith.constant 0 : index
    %c0_0 = arith.constant 0 : index
    %c0_1 = arith.constant 0 : index
    %1 = vector.load %arg7[%c0, %c0_0, %c0_1] : memref<4x18x18xf32, #tpu.memory_space<vmem>>, vector<4x18x1xf32>
    tpu.vector_store %arg7[%c0, %c0_0, %c0_1], %0 {strides = array<i32>} : memref<4x18x18xf32, #tpu.memory_space<vmem>>, vector<4x18x1xf32>,
    %cst_2 = arith.constant 0.000000e+00 : f32
    %2 = vector.broadcast %cst_2 : f32 to vector<4x18x1xf32>
    %c0_3 = arith.constant 0 : index
    %c0_4 = arith.constant 0 : index
    %c17 = arith.constant 17 : index
    %3 = vector.load %arg7[%c0_3, %c0_4, %c17] : memref<4x18x18xf32, #tpu.memory_space<vmem>>, vector<4x18x1xf32>
    tpu.vector_store %arg7[%c0_3, %c0_4, %c17], %2 {strides = array<i32>} : memref<4x18x18xf32, #tpu.memory_space<vmem>>, vector<4x18x1xf32>,
    %cst_5 = arith.constant 0.000000e+00 : f32
    %4 = vector.broadcast %cst_5 : f32 to vector<4x1x18xf32>
    %c0_6 = arith.constant 0 : index
    %c0_7 = arith.constant 0 : index
    %c0_8 = arith.constant 0 : index
    %5 = vector.load %arg7[%c0_6, %c0_7, %c0_8] : memref<4x18x18xf32, #tpu.memory_space<vmem>>, vector<4x1x18xf32>
    tpu.vector_store %arg7[%c0_6, %c0_7, %c0_8], %4 {strides = array<i32>} : memref<4x18x18xf32, #tpu.memory_space<vmem>>, vector<4x1x18xf32>,
    %cst_9 = arith.constant 0.000000e+00 : f32
    %6 = vector.broadcast %cst_9 : f32 to vector<4x1x18xf32>
    %c0_10 = arith.constant 0 : index
    %c17_11 = arith.constant 17 : index
    %c0_12 = arith.constant 0 : index
    %7 = vector.load %arg7[%c0_10, %c17_11, %c0_12] : memref<4x18x18xf32, #tpu.memory_space<vmem>>, vector<4x1x18xf32>
    tpu.vector_store %arg7[%c0_10, %c17_11, %c0_12], %6 {strides = array<i32>} : memref<4x18x18xf32, #tpu.memory_space<vmem>>, vector<4x1x18xf32>,
    %c0_13 = arith.constant 0 : index
    %c0_14 = arith.constant 0 : index
    %c0_15 = arith.constant 0 : index
    %c0_16 = arith.constant 0 : index
    %8 = vector.load %arg2[%c0_13, %c0_14, %c0_15, %c0_16] : memref<1x4x16x16xf32, #tpu.memory_space<vmem>>, vector<1x4x16x16xf32>
    %9 = vector.shape_cast %8 : vector<1x4x16x16xf32> to vector<4x16x16xf32>
    %c0_17 = arith.constant 0 : index
    %c1 = arith.constant 1 : index
    %c1_18 = arith.constant 1 : index
    %10 = vector.load %arg7[%c0_17, %c1, %c1_18] : memref<4x18x18xf32, #tpu.memory_space<vmem>>, vector<4x16x16xf32>
    tpu.vector_store %arg7[%c0_17, %c1, %c1_18], %9 {strides = array<i32>} : memref<4x18x18xf32, #tpu.memory_space<vmem>>, vector<4x16x16xf32>,
    %c0_19 = arith.constant 0 : index
    %c0_20 = arith.constant 0 : index
    %c0_21 = arith.constant 0 : index
    %11 = vector.load %arg7[%c0_19, %c0_20, %c0_21] : memref<4x18x18xf32, #tpu.memory_space<vmem>>, vector<1x16x16xf32>
    %12 = vector.shape_cast %11 : vector<1x16x16xf32> to vector<16x16xf32>
    %c0_22 = arith.constant 0 : index
    %13 = memref.load %arg3[%c0_22] : memref<36xf32, #tpu.memory_space<smem>>
    %14 = vector.broadcast %13 : f32 to vector<16x16xf32>
    %15 = arith.mulf %12, %14 : vector<16x16xf32>
    %c0_23 = arith.constant 0 : index
    %c0_24 = arith.constant 0 : index
    %c1_25 = arith.constant 1 : index
    %16 = vector.load %arg7[%c0_23, %c0_24, %c1_25] : memref<4x18x18xf32, #tpu.memory_space<vmem>>, vector<1x16x16xf32>
    %17 = vector.shape_cast %16 : vector<1x16x16xf32> to vector<16x16xf32>
    %c1_26 = arith.constant 1 : index
    %18 = memref.load %arg3[%c1_26] : memref<36xf32, #tpu.memory_space<smem>>
    %19 = vector.broadcast %18 : f32 to vector<16x16xf32>
    %20 = arith.mulf %17, %19 : vector<16x16xf32>
    %21 = arith.addf %15, %20 : vector<16x16xf32>
    %c0_27 = arith.constant 0 : index
    %c0_28 = arith.constant 0 : index
    %c2 = arith.constant 2 : index
    %22 = vector.load %arg7[%c0_27, %c0_28, %c2] : memref<4x18x18xf32, #tpu.memory_space<vmem>>, vector<1x16x16xf32>
    %23 = vector.shape_cast %22 : vector<1x16x16xf32> to vector<16x16xf32>
    %c2_29 = arith.constant 2 : index
    %24 = memref.load %arg3[%c2_29] : memref<36xf32, #tpu.memory_space<smem>>
    %25 = vector.broadcast %24 : f32 to vector<16x16xf32>
    %26 = arith.mulf %23, %25 : vector<16x16xf32>
    %27 = arith.addf %21, %26 : vector<16x16xf32>
    %c0_30 = arith.constant 0 : index
    %c1_31 = arith.constant 1 : index
    %c0_32 = arith.constant 0 : index
    %28 = vector.load %arg7[%c0_30, %c1_31, %c0_32] : memref<4x18x18xf32, #tpu.memory_space<vmem>>, vector<1x16x16xf32>
    %29 = vector.shape_cast %28 : vector<1x16x16xf32> to vector<16x16xf32>
    %c3 = arith.constant 3 : index
    %30 = memref.load %arg3[%c3] : memref<36xf32, #tpu.memory_space<smem>>
    %31 = vector.broadcast %30 : f32 to vector<16x16xf32>
    %32 = arith.mulf %29, %31 : vector<16x16xf32>
    %33 = arith.addf %27, %32 : vector<16x16xf32>
    %c0_33 = arith.constant 0 : index
    %c1_34 = arith.constant 1 : index
    %c1_35 = arith.constant 1 : index
    %34 = vector.load %arg7[%c0_33, %c1_34, %c1_35] : memref<4x18x18xf32, #tpu.memory_space<vmem>>, vector<1x16x16xf32>
    %35 = vector.shape_cast %34 : vector<1x16x16xf32> to vector<16x16xf32>
    %c4 = arith.constant 4 : index
    %36 = memref.load %arg3[%c4] : memref<36xf32, #tpu.memory_space<smem>>
    %37 = vector.broadcast %36 : f32 to vector<16x16xf32>
    %38 = arith.mulf %35, %37 : vector<16x16xf32>
    %39 = arith.addf %33, %38 : vector<16x16xf32>
    %c0_36 = arith.constant 0 : index
    %c1_37 = arith.constant 1 : index
    %c2_38 = arith.constant 2 : index
    %40 = vector.load %arg7[%c0_36, %c1_37, %c2_38] : memref<4x18x18xf32, #tpu.memory_space<vmem>>, vector<1x16x16xf32>
    %41 = vector.shape_cast %40 : vector<1x16x16xf32> to vector<16x16xf32>
    %c5 = arith.constant 5 : index
    %42 = memref.load %arg3[%c5] : memref<36xf32, #tpu.memory_space<smem>>
    %43 = vector.broadcast %42 : f32 to vector<16x16xf32>
    %44 = arith.mulf %41, %43 : vector<16x16xf32>
    %45 = arith.addf %39, %44 : vector<16x16xf32>
    %c0_39 = arith.constant 0 : index
    %c2_40 = arith.constant 2 : index
    %c0_41 = arith.constant 0 : index
    %46 = vector.load %arg7[%c0_39, %c2_40, %c0_41] : memref<4x18x18xf32, #tpu.memory_space<vmem>>, vector<1x16x16xf32>
    %47 = vector.shape_cast %46 : vector<1x16x16xf32> to vector<16x16xf32>
    %c6 = arith.constant 6 : index
    %48 = memref.load %arg3[%c6] : memref<36xf32, #tpu.memory_space<smem>>
    %49 = vector.broadcast %48 : f32 to vector<16x16xf32>
    %50 = arith.mulf %47, %49 : vector<16x16xf32>
    %51 = arith.addf %45, %50 : vector<16x16xf32>
    %c0_42 = arith.constant 0 : index
    %c2_43 = arith.constant 2 : index
    %c1_44 = arith.constant 1 : index
    %52 = vector.load %arg7[%c0_42, %c2_43, %c1_44] : memref<4x18x18xf32, #tpu.memory_space<vmem>>, vector<1x16x16xf32>
    %53 = vector.shape_cast %52 : vector<1x16x16xf32> to vector<16x16xf32>
    %c7 = arith.constant 7 : index
    %54 = memref.load %arg3[%c7] : memref<36xf32, #tpu.memory_space<smem>>
    %55 = vector.broadcast %54 : f32 to vector<16x16xf32>
    %56 = arith.mulf %53, %55 : vector<16x16xf32>
    %57 = arith.addf %51, %56 : vector<16x16xf32>
    %c0_45 = arith.constant 0 : index
    %c2_46 = arith.constant 2 : index
    %c2_47 = arith.constant 2 : index
    %58 = vector.load %arg7[%c0_45, %c2_46, %c2_47] : memref<4x18x18xf32, #tpu.memory_space<vmem>>, vector<1x16x16xf32>
    %59 = vector.shape_cast %58 : vector<1x16x16xf32> to vector<16x16xf32>
    %c8 = arith.constant 8 : index
    %60 = memref.load %arg3[%c8] : memref<36xf32, #tpu.memory_space<smem>>
    %61 = vector.broadcast %60 : f32 to vector<16x16xf32>
    %62 = arith.mulf %59, %61 : vector<16x16xf32>
    %63 = arith.addf %57, %62 : vector<16x16xf32>
    %c0_48 = arith.constant 0 : index
    %64 = memref.load %arg4[%c0_48] : memref<16xf32, #tpu.memory_space<smem>>
    %65 = vector.broadcast %64 : f32 to vector<16x16xf32>
    %66 = arith.mulf %63, %65 : vector<16x16xf32>
    %c1_49 = arith.constant 1 : index
    %67 = memref.load %arg4[%c1_49] : memref<16xf32, #tpu.memory_space<smem>>
    %68 = vector.broadcast %67 : f32 to vector<16x16xf32>
    %69 = arith.mulf %63, %68 : vector<16x16xf32>
    %c2_50 = arith.constant 2 : index
    %70 = memref.load %arg4[%c2_50] : memref<16xf32, #tpu.memory_space<smem>>
    %71 = vector.broadcast %70 : f32 to vector<16x16xf32>
    %72 = arith.mulf %63, %71 : vector<16x16xf32>
    %c3_51 = arith.constant 3 : index
    %73 = memref.load %arg4[%c3_51] : memref<16xf32, #tpu.memory_space<smem>>
    %74 = vector.broadcast %73 : f32 to vector<16x16xf32>
    %75 = arith.mulf %63, %74 : vector<16x16xf32>
    %c1_52 = arith.constant 1 : index
    %c0_53 = arith.constant 0 : index
    %c0_54 = arith.constant 0 : index
    %76 = vector.load %arg7[%c1_52, %c0_53, %c0_54] : memref<4x18x18xf32, #tpu.memory_space<vmem>>, vector<1x16x16xf32>
    %77 = vector.shape_cast %76 : vector<1x16x16xf32> to vector<16x16xf32>
    %c9 = arith.constant 9 : index
    %78 = memref.load %arg3[%c9] : memref<36xf32, #tpu.memory_space<smem>>
    %79 = vector.broadcast %78 : f32 to vector<16x16xf32>
    %80 = arith.mulf %77, %79 : vector<16x16xf32>
    %c1_55 = arith.constant 1 : index
    %c0_56 = arith.constant 0 : index
    %c1_57 = arith.constant 1 : index
    %81 = vector.load %arg7[%c1_55, %c0_56, %c1_57] : memref<4x18x18xf32, #tpu.memory_space<vmem>>, vector<1x16x16xf32>
    %82 = vector.shape_cast %81 : vector<1x16x16xf32> to vector<16x16xf32>
    %c10 = arith.constant 10 : index
    %83 = memref.load %arg3[%c10] : memref<36xf32, #tpu.memory_space<smem>>
    %84 = vector.broadcast %83 : f32 to vector<16x16xf32>
    %85 = arith.mulf %82, %84 : vector<16x16xf32>
    %86 = arith.addf %80, %85 : vector<16x16xf32>
    %c1_58 = arith.constant 1 : index
    %c0_59 = arith.constant 0 : index
    %c2_60 = arith.constant 2 : index
    %87 = vector.load %arg7[%c1_58, %c0_59, %c2_60] : memref<4x18x18xf32, #tpu.memory_space<vmem>>, vector<1x16x16xf32>
    %88 = vector.shape_cast %87 : vector<1x16x16xf32> to vector<16x16xf32>
    %c11 = arith.constant 11 : index
    %89 = memref.load %arg3[%c11] : memref<36xf32, #tpu.memory_space<smem>>
    %90 = vector.broadcast %89 : f32 to vector<16x16xf32>
    %91 = arith.mulf %88, %90 : vector<16x16xf32>
    %92 = arith.addf %86, %91 : vector<16x16xf32>
    %c1_61 = arith.constant 1 : index
    %c1_62 = arith.constant 1 : index
    %c0_63 = arith.constant 0 : index
    %93 = vector.load %arg7[%c1_61, %c1_62, %c0_63] : memref<4x18x18xf32, #tpu.memory_space<vmem>>, vector<1x16x16xf32>
    %94 = vector.shape_cast %93 : vector<1x16x16xf32> to vector<16x16xf32>
    %c12 = arith.constant 12 : index
    %95 = memref.load %arg3[%c12] : memref<36xf32, #tpu.memory_space<smem>>
    %96 = vector.broadcast %95 : f32 to vector<16x16xf32>
    %97 = arith.mulf %94, %96 : vector<16x16xf32>
    %98 = arith.addf %92, %97 : vector<16x16xf32>
    %c1_64 = arith.constant 1 : index
    %c1_65 = arith.constant 1 : index
    %c1_66 = arith.constant 1 : index
    %99 = vector.load %arg7[%c1_64, %c1_65, %c1_66] : memref<4x18x18xf32, #tpu.memory_space<vmem>>, vector<1x16x16xf32>
    %100 = vector.shape_cast %99 : vector<1x16x16xf32> to vector<16x16xf32>
    %c13 = arith.constant 13 : index
    %101 = memref.load %arg3[%c13] : memref<36xf32, #tpu.memory_space<smem>>
    %102 = vector.broadcast %101 : f32 to vector<16x16xf32>
    %103 = arith.mulf %100, %102 : vector<16x16xf32>
    %104 = arith.addf %98, %103 : vector<16x16xf32>
    %c1_67 = arith.constant 1 : index
    %c1_68 = arith.constant 1 : index
    %c2_69 = arith.constant 2 : index
    %105 = vector.load %arg7[%c1_67, %c1_68, %c2_69] : memref<4x18x18xf32, #tpu.memory_space<vmem>>, vector<1x16x16xf32>
    %106 = vector.shape_cast %105 : vector<1x16x16xf32> to vector<16x16xf32>
    %c14 = arith.constant 14 : index
    %107 = memref.load %arg3[%c14] : memref<36xf32, #tpu.memory_space<smem>>
    %108 = vector.broadcast %107 : f32 to vector<16x16xf32>
    %109 = arith.mulf %106, %108 : vector<16x16xf32>
    %110 = arith.addf %104, %109 : vector<16x16xf32>
    %c1_70 = arith.constant 1 : index
    %c2_71 = arith.constant 2 : index
    %c0_72 = arith.constant 0 : index
    %111 = vector.load %arg7[%c1_70, %c2_71, %c0_72] : memref<4x18x18xf32, #tpu.memory_space<vmem>>, vector<1x16x16xf32>
    %112 = vector.shape_cast %111 : vector<1x16x16xf32> to vector<16x16xf32>
    %c15 = arith.constant 15 : index
    %113 = memref.load %arg3[%c15] : memref<36xf32, #tpu.memory_space<smem>>
    %114 = vector.broadcast %113 : f32 to vector<16x16xf32>
    %115 = arith.mulf %112, %114 : vector<16x16xf32>
    %116 = arith.addf %110, %115 : vector<16x16xf32>
    %c1_73 = arith.constant 1 : index
    %c2_74 = arith.constant 2 : index
    %c1_75 = arith.constant 1 : index
    %117 = vector.load %arg7[%c1_73, %c2_74, %c1_75] : memref<4x18x18xf32, #tpu.memory_space<vmem>>, vector<1x16x16xf32>
    %118 = vector.shape_cast %117 : vector<1x16x16xf32> to vector<16x16xf32>
    %c16 = arith.constant 16 : index
    %119 = memref.load %arg3[%c16] : memref<36xf32, #tpu.memory_space<smem>>
    %120 = vector.broadcast %119 : f32 to vector<16x16xf32>
    %121 = arith.mulf %118, %120 : vector<16x16xf32>
    %122 = arith.addf %116, %121 : vector<16x16xf32>
    %c1_76 = arith.constant 1 : index
    %c2_77 = arith.constant 2 : index
    %c2_78 = arith.constant 2 : index
    %123 = vector.load %arg7[%c1_76, %c2_77, %c2_78] : memref<4x18x18xf32, #tpu.memory_space<vmem>>, vector<1x16x16xf32>
    %124 = vector.shape_cast %123 : vector<1x16x16xf32> to vector<16x16xf32>
    %c17_79 = arith.constant 17 : index
    %125 = memref.load %arg3[%c17_79] : memref<36xf32, #tpu.memory_space<smem>>
    %126 = vector.broadcast %125 : f32 to vector<16x16xf32>
    %127 = arith.mulf %124, %126 : vector<16x16xf32>
    %128 = arith.addf %122, %127 : vector<16x16xf32>
    %c4_80 = arith.constant 4 : index
    %129 = memref.load %arg4[%c4_80] : memref<16xf32, #tpu.memory_space<smem>>
    %130 = vector.broadcast %129 : f32 to vector<16x16xf32>
    %131 = arith.mulf %128, %130 : vector<16x16xf32>
    %132 = arith.addf %66, %131 : vector<16x16xf32>
    %c5_81 = arith.constant 5 : index
    %133 = memref.load %arg4[%c5_81] : memref<16xf32, #tpu.memory_space<smem>>
    %134 = vector.broadcast %133 : f32 to vector<16x16xf32>
    %135 = arith.mulf %128, %134 : vector<16x16xf32>
    %136 = arith.addf %69, %135 : vector<16x16xf32>
    %c6_82 = arith.constant 6 : index
    %137 = memref.load %arg4[%c6_82] : memref<16xf32, #tpu.memory_space<smem>>
    %138 = vector.broadcast %137 : f32 to vector<16x16xf32>
    %139 = arith.mulf %128, %138 : vector<16x16xf32>
    %140 = arith.addf %72, %139 : vector<16x16xf32>
    %c7_83 = arith.constant 7 : index
    %141 = memref.load %arg4[%c7_83] : memref<16xf32, #tpu.memory_space<smem>>
    %142 = vector.broadcast %141 : f32 to vector<16x16xf32>
    %143 = arith.mulf %128, %142 : vector<16x16xf32>
    %144 = arith.addf %75, %143 : vector<16x16xf32>
    %c2_84 = arith.constant 2 : index
    %c0_85 = arith.constant 0 : index
    %c0_86 = arith.constant 0 : index
    %145 = vector.load %arg7[%c2_84, %c0_85, %c0_86] : memref<4x18x18xf32, #tpu.memory_space<vmem>>, vector<1x16x16xf32>
    %146 = vector.shape_cast %145 : vector<1x16x16xf32> to vector<16x16xf32>
    %c18 = arith.constant 18 : index
    %147 = memref.load %arg3[%c18] : memref<36xf32, #tpu.memory_space<smem>>
    %148 = vector.broadcast %147 : f32 to vector<16x16xf32>
    %149 = arith.mulf %146, %148 : vector<16x16xf32>
    %c2_87 = arith.constant 2 : index
    %c0_88 = arith.constant 0 : index
    %c1_89 = arith.constant 1 : index
    %150 = vector.load %arg7[%c2_87, %c0_88, %c1_89] : memref<4x18x18xf32, #tpu.memory_space<vmem>>, vector<1x16x16xf32>
    %151 = vector.shape_cast %150 : vector<1x16x16xf32> to vector<16x16xf32>
    %c19 = arith.constant 19 : index
    %152 = memref.load %arg3[%c19] : memref<36xf32, #tpu.memory_space<smem>>
    %153 = vector.broadcast %152 : f32 to vector<16x16xf32>
    %154 = arith.mulf %151, %153 : vector<16x16xf32>
    %155 = arith.addf %149, %154 : vector<16x16xf32>
    %c2_90 = arith.constant 2 : index
    %c0_91 = arith.constant 0 : index
    %c2_92 = arith.constant 2 : index
    %156 = vector.load %arg7[%c2_90, %c0_91, %c2_92] : memref<4x18x18xf32, #tpu.memory_space<vmem>>, vector<1x16x16xf32>
    %157 = vector.shape_cast %156 : vector<1x16x16xf32> to vector<16x16xf32>
    %c20 = arith.constant 20 : index
    %158 = memref.load %arg3[%c20] : memref<36xf32, #tpu.memory_space<smem>>
    %159 = vector.broadcast %158 : f32 to vector<16x16xf32>
    %160 = arith.mulf %157, %159 : vector<16x16xf32>
    %161 = arith.addf %155, %160 : vector<16x16xf32>
    %c2_93 = arith.constant 2 : index
    %c1_94 = arith.constant 1 : index
    %c0_95 = arith.constant 0 : index
    %162 = vector.load %arg7[%c2_93, %c1_94, %c0_95] : memref<4x18x18xf32, #tpu.memory_space<vmem>>, vector<1x16x16xf32>
    %163 = vector.shape_cast %162 : vector<1x16x16xf32> to vector<16x16xf32>
    %c21 = arith.constant 21 : index
    %164 = memref.load %arg3[%c21] : memref<36xf32, #tpu.memory_space<smem>>
    %165 = vector.broadcast %164 : f32 to vector<16x16xf32>
    %166 = arith.mulf %163, %165 : vector<16x16xf32>
    %167 = arith.addf %161, %166 : vector<16x16xf32>
    %c2_96 = arith.constant 2 : index
    %c1_97 = arith.constant 1 : index
    %c1_98 = arith.constant 1 : index
    %168 = vector.load %arg7[%c2_96, %c1_97, %c1_98] : memref<4x18x18xf32, #tpu.memory_space<vmem>>, vector<1x16x16xf32>
    %169 = vector.shape_cast %168 : vector<1x16x16xf32> to vector<16x16xf32>
    %c22 = arith.constant 22 : index
    %170 = memref.load %arg3[%c22] : memref<36xf32, #tpu.memory_space<smem>>
    %171 = vector.broadcast %170 : f32 to vector<16x16xf32>
    %172 = arith.mulf %169, %171 : vector<16x16xf32>
    %173 = arith.addf %167, %172 : vector<16x16xf32>
    %c2_99 = arith.constant 2 : index
    %c1_100 = arith.constant 1 : index
    %c2_101 = arith.constant 2 : index
    %174 = vector.load %arg7[%c2_99, %c1_100, %c2_101] : memref<4x18x18xf32, #tpu.memory_space<vmem>>, vector<1x16x16xf32>
    %175 = vector.shape_cast %174 : vector<1x16x16xf32> to vector<16x16xf32>
    %c23 = arith.constant 23 : index
    %176 = memref.load %arg3[%c23] : memref<36xf32, #tpu.memory_space<smem>>
    %177 = vector.broadcast %176 : f32 to vector<16x16xf32>
    %178 = arith.mulf %175, %177 : vector<16x16xf32>
    %179 = arith.addf %173, %178 : vector<16x16xf32>
    %c2_102 = arith.constant 2 : index
    %c2_103 = arith.constant 2 : index
    %c0_104 = arith.constant 0 : index
    %180 = vector.load %arg7[%c2_102, %c2_103, %c0_104] : memref<4x18x18xf32, #tpu.memory_space<vmem>>, vector<1x16x16xf32>
    %181 = vector.shape_cast %180 : vector<1x16x16xf32> to vector<16x16xf32>
    %c24 = arith.constant 24 : index
    %182 = memref.load %arg3[%c24] : memref<36xf32, #tpu.memory_space<smem>>
    %183 = vector.broadcast %182 : f32 to vector<16x16xf32>
    %184 = arith.mulf %181, %183 : vector<16x16xf32>
    %185 = arith.addf %179, %184 : vector<16x16xf32>
    %c2_105 = arith.constant 2 : index
    %c2_106 = arith.constant 2 : index
    %c1_107 = arith.constant 1 : index
    %186 = vector.load %arg7[%c2_105, %c2_106, %c1_107] : memref<4x18x18xf32, #tpu.memory_space<vmem>>, vector<1x16x16xf32>
    %187 = vector.shape_cast %186 : vector<1x16x16xf32> to vector<16x16xf32>
    %c25 = arith.constant 25 : index
    %188 = memref.load %arg3[%c25] : memref<36xf32, #tpu.memory_space<smem>>
    %189 = vector.broadcast %188 : f32 to vector<16x16xf32>
    %190 = arith.mulf %187, %189 : vector<16x16xf32>
    %191 = arith.addf %185, %190 : vector<16x16xf32>
    %c2_108 = arith.constant 2 : index
    %c2_109 = arith.constant 2 : index
    %c2_110 = arith.constant 2 : index
    %192 = vector.load %arg7[%c2_108, %c2_109, %c2_110] : memref<4x18x18xf32, #tpu.memory_space<vmem>>, vector<1x16x16xf32>
    %193 = vector.shape_cast %192 : vector<1x16x16xf32> to vector<16x16xf32>
    %c26 = arith.constant 26 : index
    %194 = memref.load %arg3[%c26] : memref<36xf32, #tpu.memory_space<smem>>
    %195 = vector.broadcast %194 : f32 to vector<16x16xf32>
    %196 = arith.mulf %193, %195 : vector<16x16xf32>
    %197 = arith.addf %191, %196 : vector<16x16xf32>
    %c8_111 = arith.constant 8 : index
    %198 = memref.load %arg4[%c8_111] : memref<16xf32, #tpu.memory_space<smem>>
    %199 = vector.broadcast %198 : f32 to vector<16x16xf32>
    %200 = arith.mulf %197, %199 : vector<16x16xf32>
    %201 = arith.addf %132, %200 : vector<16x16xf32>
    %c9_112 = arith.constant 9 : index
    %202 = memref.load %arg4[%c9_112] : memref<16xf32, #tpu.memory_space<smem>>
    %203 = vector.broadcast %202 : f32 to vector<16x16xf32>
    %204 = arith.mulf %197, %203 : vector<16x16xf32>
    %205 = arith.addf %136, %204 : vector<16x16xf32>
    %c10_113 = arith.constant 10 : index
    %206 = memref.load %arg4[%c10_113] : memref<16xf32, #tpu.memory_space<smem>>
    %207 = vector.broadcast %206 : f32 to vector<16x16xf32>
    %208 = arith.mulf %197, %207 : vector<16x16xf32>
    %209 = arith.addf %140, %208 : vector<16x16xf32>
    %c11_114 = arith.constant 11 : index
    %210 = memref.load %arg4[%c11_114] : memref<16xf32, #tpu.memory_space<smem>>
    %211 = vector.broadcast %210 : f32 to vector<16x16xf32>
    %212 = arith.mulf %197, %211 : vector<16x16xf32>
    %213 = arith.addf %144, %212 : vector<16x16xf32>
    %c3_115 = arith.constant 3 : index
    %c0_116 = arith.constant 0 : index
    %c0_117 = arith.constant 0 : index
    %214 = vector.load %arg7[%c3_115, %c0_116, %c0_117] : memref<4x18x18xf32, #tpu.memory_space<vmem>>, vector<1x16x16xf32>
    %215 = vector.shape_cast %214 : vector<1x16x16xf32> to vector<16x16xf32>
    %c27 = arith.constant 27 : index
    %216 = memref.load %arg3[%c27] : memref<36xf32, #tpu.memory_space<smem>>
    %217 = vector.broadcast %216 : f32 to vector<16x16xf32>
    %218 = arith.mulf %215, %217 : vector<16x16xf32>
    %c3_118 = arith.constant 3 : index
    %c0_119 = arith.constant 0 : index
    %c1_120 = arith.constant 1 : index
    %219 = vector.load %arg7[%c3_118, %c0_119, %c1_120] : memref<4x18x18xf32, #tpu.memory_space<vmem>>, vector<1x16x16xf32>
    %220 = vector.shape_cast %219 : vector<1x16x16xf32> to vector<16x16xf32>
    %c28 = arith.constant 28 : index
    %221 = memref.load %arg3[%c28] : memref<36xf32, #tpu.memory_space<smem>>
    %222 = vector.broadcast %221 : f32 to vector<16x16xf32>
    %223 = arith.mulf %220, %222 : vector<16x16xf32>
    %224 = arith.addf %218, %223 : vector<16x16xf32>
    %c3_121 = arith.constant 3 : index
    %c0_122 = arith.constant 0 : index
    %c2_123 = arith.constant 2 : index
    %225 = vector.load %arg7[%c3_121, %c0_122, %c2_123] : memref<4x18x18xf32, #tpu.memory_space<vmem>>, vector<1x16x16xf32>
    %226 = vector.shape_cast %225 : vector<1x16x16xf32> to vector<16x16xf32>
    %c29 = arith.constant 29 : index
    %227 = memref.load %arg3[%c29] : memref<36xf32, #tpu.memory_space<smem>>
    %228 = vector.broadcast %227 : f32 to vector<16x16xf32>
    %229 = arith.mulf %226, %228 : vector<16x16xf32>
    %230 = arith.addf %224, %229 : vector<16x16xf32>
    %c3_124 = arith.constant 3 : index
    %c1_125 = arith.constant 1 : index
    %c0_126 = arith.constant 0 : index
    %231 = vector.load %arg7[%c3_124, %c1_125, %c0_126] : memref<4x18x18xf32, #tpu.memory_space<vmem>>, vector<1x16x16xf32>
    %232 = vector.shape_cast %231 : vector<1x16x16xf32> to vector<16x16xf32>
    %c30 = arith.constant 30 : index
    %233 = memref.load %arg3[%c30] : memref<36xf32, #tpu.memory_space<smem>>
    %234 = vector.broadcast %233 : f32 to vector<16x16xf32>
    %235 = arith.mulf %232, %234 : vector<16x16xf32>
    %236 = arith.addf %230, %235 : vector<16x16xf32>
    %c3_127 = arith.constant 3 : index
    %c1_128 = arith.constant 1 : index
    %c1_129 = arith.constant 1 : index
    %237 = vector.load %arg7[%c3_127, %c1_128, %c1_129] : memref<4x18x18xf32, #tpu.memory_space<vmem>>, vector<1x16x16xf32>
    %238 = vector.shape_cast %237 : vector<1x16x16xf32> to vector<16x16xf32>
    %c31 = arith.constant 31 : index
    %239 = memref.load %arg3[%c31] : memref<36xf32, #tpu.memory_space<smem>>
    %240 = vector.broadcast %239 : f32 to vector<16x16xf32>
    %241 = arith.mulf %238, %240 : vector<16x16xf32>
    %242 = arith.addf %236, %241 : vector<16x16xf32>
    %c3_130 = arith.constant 3 : index
    %c1_131 = arith.constant 1 : index
    %c2_132 = arith.constant 2 : index
    %243 = vector.load %arg7[%c3_130, %c1_131, %c2_132] : memref<4x18x18xf32, #tpu.memory_space<vmem>>, vector<1x16x16xf32>
    %244 = vector.shape_cast %243 : vector<1x16x16xf32> to vector<16x16xf32>
    %c32 = arith.constant 32 : index
    %245 = memref.load %arg3[%c32] : memref<36xf32, #tpu.memory_space<smem>>
    %246 = vector.broadcast %245 : f32 to vector<16x16xf32>
    %247 = arith.mulf %244, %246 : vector<16x16xf32>
    %248 = arith.addf %242, %247 : vector<16x16xf32>
    %c3_133 = arith.constant 3 : index
    %c2_134 = arith.constant 2 : index
    %c0_135 = arith.constant 0 : index
    %249 = vector.load %arg7[%c3_133, %c2_134, %c0_135] : memref<4x18x18xf32, #tpu.memory_space<vmem>>, vector<1x16x16xf32>
    %250 = vector.shape_cast %249 : vector<1x16x16xf32> to vector<16x16xf32>
    %c33 = arith.constant 33 : index
    %251 = memref.load %arg3[%c33] : memref<36xf32, #tpu.memory_space<smem>>
    %252 = vector.broadcast %251 : f32 to vector<16x16xf32>
    %253 = arith.mulf %250, %252 : vector<16x16xf32>
    %254 = arith.addf %248, %253 : vector<16x16xf32>
    %c3_136 = arith.constant 3 : index
    %c2_137 = arith.constant 2 : index
    %c1_138 = arith.constant 1 : index
    %255 = vector.load %arg7[%c3_136, %c2_137, %c1_138] : memref<4x18x18xf32, #tpu.memory_space<vmem>>, vector<1x16x16xf32>
    %256 = vector.shape_cast %255 : vector<1x16x16xf32> to vector<16x16xf32>
    %c34 = arith.constant 34 : index
    %257 = memref.load %arg3[%c34] : memref<36xf32, #tpu.memory_space<smem>>
    %258 = vector.broadcast %257 : f32 to vector<16x16xf32>
    %259 = arith.mulf %256, %258 : vector<16x16xf32>
    %260 = arith.addf %254, %259 : vector<16x16xf32>
    %c3_139 = arith.constant 3 : index
    %c2_140 = arith.constant 2 : index
    %c2_141 = arith.constant 2 : index
    %261 = vector.load %arg7[%c3_139, %c2_140, %c2_141] : memref<4x18x18xf32, #tpu.memory_space<vmem>>, vector<1x16x16xf32>
    %262 = vector.shape_cast %261 : vector<1x16x16xf32> to vector<16x16xf32>
    %c35 = arith.constant 35 : index
    %263 = memref.load %arg3[%c35] : memref<36xf32, #tpu.memory_space<smem>>
    %264 = vector.broadcast %263 : f32 to vector<16x16xf32>
    %265 = arith.mulf %262, %264 : vector<16x16xf32>
    %266 = arith.addf %260, %265 : vector<16x16xf32>
    %c12_142 = arith.constant 12 : index
    %267 = memref.load %arg4[%c12_142] : memref<16xf32, #tpu.memory_space<smem>>
    %268 = vector.broadcast %267 : f32 to vector<16x16xf32>
    %269 = arith.mulf %266, %268 : vector<16x16xf32>
    %270 = arith.addf %201, %269 : vector<16x16xf32>
    %c13_143 = arith.constant 13 : index
    %271 = memref.load %arg4[%c13_143] : memref<16xf32, #tpu.memory_space<smem>>
    %272 = vector.broadcast %271 : f32 to vector<16x16xf32>
    %273 = arith.mulf %266, %272 : vector<16x16xf32>
    %274 = arith.addf %205, %273 : vector<16x16xf32>
    %c14_144 = arith.constant 14 : index
    %275 = memref.load %arg4[%c14_144] : memref<16xf32, #tpu.memory_space<smem>>
    %276 = vector.broadcast %275 : f32 to vector<16x16xf32>
    %277 = arith.mulf %266, %276 : vector<16x16xf32>
    %278 = arith.addf %209, %277 : vector<16x16xf32>
    %c15_145 = arith.constant 15 : index
    %279 = memref.load %arg4[%c15_145] : memref<16xf32, #tpu.memory_space<smem>>
    %280 = vector.broadcast %279 : f32 to vector<16x16xf32>
    %281 = arith.mulf %266, %280 : vector<16x16xf32>
    %282 = arith.addf %213, %281 : vector<16x16xf32>
    %c0_146 = arith.constant 0 : index
    %283 = memref.load %arg5[%c0_146] : memref<4xf32, #tpu.memory_space<smem>>
    %284 = vector.broadcast %283 : f32 to vector<16x16xf32>
    %285 = arith.addf %270, %284 : vector<16x16xf32>
    %c0_147 = arith.constant 0 : index
    %c0_148 = arith.constant 0 : index
    %c0_149 = arith.constant 0 : index
    %c0_150 = arith.constant 0 : index
    %286 = vector.load %arg2[%c0_147, %c0_148, %c0_149, %c0_150] : memref<1x4x16x16xf32, #tpu.memory_space<vmem>>, vector<1x1x16x16xf32>
    %287 = vector.shape_cast %286 : vector<1x1x16x16xf32> to vector<16x16xf32>
    %288 = arith.addf %285, %287 : vector<16x16xf32>
    %cst_151 = arith.constant 0.000000e+00 : f32
    %289 = vector.broadcast %cst_151 : f32 to vector<16x16xf32>
    %290 = arith.maximumf %288, %289 : vector<16x16xf32>
    %c0_152 = arith.constant 0 : index
    %c0_153 = arith.constant 0 : index
    %c0_154 = arith.constant 0 : index
    %c0_155 = arith.constant 0 : index
    %291 = vector.load %arg6[%c0_152, %c0_153, %c0_154, %c0_155] : memref<1x4x16x16xf32, #tpu.memory_space<vmem>>, vector<1x1x16x16xf32>
    %292 = vector.shape_cast %291 : vector<1x1x16x16xf32> to vector<16x16xf32>
    %293 = vector.shape_cast %290 : vector<16x16xf32> to vector<1x1x16x16xf32>
    tpu.vector_store %arg6[%c0_152, %c0_153, %c0_154, %c0_155], %293 {strides = array<i32>} : memref<1x4x16x16xf32, #tpu.memory_space<vmem>>, vector<1x1x16x16xf32>,
    %c1_156 = arith.constant 1 : index
    %294 = memref.load %arg5[%c1_156] : memref<4xf32, #tpu.memory_space<smem>>
    %295 = vector.broadcast %294 : f32 to vector<16x16xf32>
    %296 = arith.addf %274, %295 : vector<16x16xf32>
    %c0_157 = arith.constant 0 : index
    %c1_158 = arith.constant 1 : index
    %c0_159 = arith.constant 0 : index
    %c0_160 = arith.constant 0 : index
    %297 = vector.load %arg2[%c0_157, %c1_158, %c0_159, %c0_160] : memref<1x4x16x16xf32, #tpu.memory_space<vmem>>, vector<1x1x16x16xf32>
    %298 = vector.shape_cast %297 : vector<1x1x16x16xf32> to vector<16x16xf32>
    %299 = arith.addf %296, %298 : vector<16x16xf32>
    %cst_161 = arith.constant 0.000000e+00 : f32
    %300 = vector.broadcast %cst_161 : f32 to vector<16x16xf32>
    %301 = arith.maximumf %299, %300 : vector<16x16xf32>
    %c0_162 = arith.constant 0 : index
    %c1_163 = arith.constant 1 : index
    %c0_164 = arith.constant 0 : index
    %c0_165 = arith.constant 0 : index
    %302 = vector.load %arg6[%c0_162, %c1_163, %c0_164, %c0_165] : memref<1x4x16x16xf32, #tpu.memory_space<vmem>>, vector<1x1x16x16xf32>
    %303 = vector.shape_cast %302 : vector<1x1x16x16xf32> to vector<16x16xf32>
    %304 = vector.shape_cast %301 : vector<16x16xf32> to vector<1x1x16x16xf32>
    tpu.vector_store %arg6[%c0_162, %c1_163, %c0_164, %c0_165], %304 {strides = array<i32>} : memref<1x4x16x16xf32, #tpu.memory_space<vmem>>, vector<1x1x16x16xf32>,
    %c2_166 = arith.constant 2 : index
    %305 = memref.load %arg5[%c2_166] : memref<4xf32, #tpu.memory_space<smem>>
    %306 = vector.broadcast %305 : f32 to vector<16x16xf32>
    %307 = arith.addf %278, %306 : vector<16x16xf32>
    %c0_167 = arith.constant 0 : index
    %c2_168 = arith.constant 2 : index
    %c0_169 = arith.constant 0 : index
    %c0_170 = arith.constant 0 : index
    %308 = vector.load %arg2[%c0_167, %c2_168, %c0_169, %c0_170] : memref<1x4x16x16xf32, #tpu.memory_space<vmem>>, vector<1x1x16x16xf32>
    %309 = vector.shape_cast %308 : vector<1x1x16x16xf32> to vector<16x16xf32>
    %310 = arith.addf %307, %309 : vector<16x16xf32>
    %cst_171 = arith.constant 0.000000e+00 : f32
    %311 = vector.broadcast %cst_171 : f32 to vector<16x16xf32>
    %312 = arith.maximumf %310, %311 : vector<16x16xf32>
    %c0_172 = arith.constant 0 : index
    %c2_173 = arith.constant 2 : index
    %c0_174 = arith.constant 0 : index
    %c0_175 = arith.constant 0 : index
    %313 = vector.load %arg6[%c0_172, %c2_173, %c0_174, %c0_175] : memref<1x4x16x16xf32, #tpu.memory_space<vmem>>, vector<1x1x16x16xf32>
    %314 = vector.shape_cast %313 : vector<1x1x16x16xf32> to vector<16x16xf32>
    %315 = vector.shape_cast %312 : vector<16x16xf32> to vector<1x1x16x16xf32>
    tpu.vector_store %arg6[%c0_172, %c2_173, %c0_174, %c0_175], %315 {strides = array<i32>} : memref<1x4x16x16xf32, #tpu.memory_space<vmem>>, vector<1x1x16x16xf32>,
    %c3_176 = arith.constant 3 : index
    %316 = memref.load %arg5[%c3_176] : memref<4xf32, #tpu.memory_space<smem>>
    %317 = vector.broadcast %316 : f32 to vector<16x16xf32>
    %318 = arith.addf %282, %317 : vector<16x16xf32>
    %c0_177 = arith.constant 0 : index
    %c3_178 = arith.constant 3 : index
    %c0_179 = arith.constant 0 : index
    %c0_180 = arith.constant 0 : index
    %319 = vector.load %arg2[%c0_177, %c3_178, %c0_179, %c0_180] : memref<1x4x16x16xf32, #tpu.memory_space<vmem>>, vector<1x1x16x16xf32>
    %320 = vector.shape_cast %319 : vector<1x1x16x16xf32> to vector<16x16xf32>
    %321 = arith.addf %318, %320 : vector<16x16xf32>
    %cst_181 = arith.constant 0.000000e+00 : f32
    %322 = vector.broadcast %cst_181 : f32 to vector<16x16xf32>
    %323 = arith.maximumf %321, %322 : vector<16x16xf32>
    %c0_182 = arith.constant 0 : index
    %c3_183 = arith.constant 3 : index
    %c0_184 = arith.constant 0 : index
    %c0_185 = arith.constant 0 : index
    %324 = vector.load %arg6[%c0_182, %c3_183, %c0_184, %c0_185] : memref<1x4x16x16xf32, #tpu.memory_space<vmem>>, vector<1x1x16x16xf32>
    %325 = vector.shape_cast %324 : vector<1x1x16x16xf32> to vector<16x16xf32>
    %326 = vector.shape_cast %323 : vector<16x16xf32> to vector<1x1x16x16xf32>
    tpu.vector_store %arg6[%c0_182, %c3_183, %c0_184, %c0_185], %326 {strides = array<i32>} : memref<1x4x16x16xf32, #tpu.memory_space<vmem>>, vector<1x1x16x16xf32>,
    return
  }
  func.func @transform_0(%arg0: i32, %arg1: i32) -> (i32, i32, i32, i32) {
    %c0_i32 = arith.constant 0 : i32
    %c0_i32_0 = arith.constant 0 : i32
    %c0_i32_1 = arith.constant 0 : i32
    return %arg0, %c0_i32, %arg1, %c0_i32_0 : i32, i32, i32, i32
  }
  func.func @transform_1(%arg0: i32, %arg1: i32) -> i32 {
    %c0_i32 = arith.constant 0 : i32
    %c0_i32_0 = arith.constant 0 : i32
    return %c0_i32 : i32
  }
  func.func @transform_2(%arg0: i32, %arg1: i32) -> i32 {
    %c0_i32 = arith.constant 0 : i32
    %c0_i32_0 = arith.constant 0 : i32
    return %c0_i32 : i32
  }
  func.func @transform_3(%arg0: i32, %arg1: i32) -> i32 {
    %c0_i32 = arith.constant 0 : i32
    %c0_i32_0 = arith.constant 0 : i32
    return %c0_i32 : i32
  }
  func.func @transform_4(%arg0: i32, %arg1: i32) -> (i32, i32, i32, i32) {
    %c0_i32 = arith.constant 0 : i32
    %c0_i32_0 = arith.constant 0 : i32
    %c0_i32_1 = arith.constant 0 : i32
    return %arg0, %c0_i32, %arg1, %c0_i32_0 : i32, i32, i32, i32
  }
}

</mosaic_0001>

<bundles_post_ra>
// kernel: tpu_custom_call.1
= control target key start
LH: loop header
LB: loop body
LE: loop exit
PB: predicated region body
PF: predicated region fallthrough
CT: control target
= control target key end

     0   :  { %9 = vsyncpa [#allocation4], 0  ;;  %s2021_s0 = inlined_call_operand.hbm [shape: f32[2,4,16,16], index: 0, kind: input, shape index: {}]   ;;  %s2022_s1 = inlined_call_operand.vmem [shape: f32[36], index: 1, kind: input, shape index: {}]   ;;  %s2023_s2 = inlined_call_operand.vmem [shape: f32[16], index: 2, kind: input, shape index: {}]   ;;  %s2024_s3 = inlined_call_operand.vmem [shape: f32[4], index: 3, kind: input, shape index: {}]   ;;  %s2025_s4 = inlined_call_operand.hbm [shape: f32[2,4,16,16], index: 4, kind: output, shape index: {}]  }
   0x1   :  { %11 = vsyncpa [#allocation4 + $0x1], 0 }
   0x2   :  { %12 = vsyncpa [#allocation6], 0 }
   0x3   :  { %13 = vsyncpa [#allocation9], 0 }
   0x4   :  { %14 = vsyncpa [#allocation5], 0 }
   0x5   :  { %16 = vsyncpa [#allocation5 + $0x1], 0  ;;  %s1455_s15 = smov 0   ;;  %s1457_s16 = smov 0  }
   0x6   :  { %s1459_s17 = smov 0   ;;  %s1461_s18 = smov 0  }
   0x7   :  { %s1463_s19 = smov 0   ;;  %s1465_s20 = smov 0  }
   0x8 LB: > { %s1065_s21 = sadd.s32 4294967295, %s1415_s20   ;;  %s1066_s22 = sadd.s32 4294967294, %s1415_s20   ;;  %s1415_s20 = sphi %s1465_s20, %s22_s20   ;;  %s1411_s19 = sphi %s1463_s19, %s2048_s19   ;;  %s1407_s18 = sphi %s1461_s18, %s2047_s18   ;;  %s1403_s17 = sphi %s1459_s17, %s2046_s17   ;;  %s1399_s16 = sphi %s1457_s16, %s2045_s16   ;;  %s1395_s15 = sphi %s1455_s15, %s2044_s15  }
   0x9   : > { %p56_p0 = scmp.ne.s32.totalorder %s1399_s16, %s1395_s15  ;;  %p1489_p1 = scmp.eq.s32.totalorder %s1065_s21, 0 }
   0xa   : > { %p1493_p2 = scmp.eq.s32.totalorder %s1065_s21, 1  ;;  %p151_p3 = scmp.eq.s32.totalorder %s1066_s22, 1 }
   0xb   : > { %s2030_s23 = scalar_select %p1489_p1, 1, 0 }
   0xc   : > { %s2031_s24 = scalar_select %p1493_p2, 1, 0 }
   0xd   : > { %p1499_p4 = por %p1489_p1, %p56_p0  ;;  %p1067_p5 = scmp.ge.s32.totalorder %s1415_s20, 1 }
   0xe   : > { %p1504_p6 = por %p151_p3, %p56_p0  ;;  %p158_p7 = scmp.lt.s32.totalorder %s1415_s20, 3 }
   0xf   : > { %s2032_s25 = scalar_select %p1499_p4, 1, 0 }
  0x10   : > { %s2033_s26 = scalar_select %p1504_p6, 1, 0 }
  0x11   : > { %s182_s29 = sshll.u32 %s2023_s2, 4  ;;  %p1512_p8 = pnand %p1067_p5, %p158_p7  ;;  %s183_s29 = int_to_ptr.vmem [resolvable:$true] %s182_s29 }
  0x12   : > { %s171_s7 = sshll.u32 %s2022_s1, 4  ;;  %s193_s11 = sshll.u32 %s2024_s3, 4  ;;  %s172_s7 = int_to_ptr.vmem [resolvable:$true] %s171_s7  ;;  %s1531_s11 = int_to_ptr.vmem [resolvable:$true] %s193_s11 }
  0x13   : > { %s2034_s30 = scalar_select %p1512_p8, 1, 0 }
  0x14   : > { %p1169_p10 = pneg %p1512_p8  ;;  %s1254_s12 = scalar_lea.vmem %s183_s29, 16 }
  0x15   : > { %p1255_p12 = scmp.ne.s32.totalorder %s183_s29, %s1254_s12  ;;  %p1262_p5 = scmp.lt.s32.totalorder %s183_s29, %s183_s29 }
  0x16   : > { %p1524_p11 = pnand %p1169_p10, %p1489_p1  ;;  %p1263_p7 = scmp.lt.s32.totalorder %s1254_s12, %s1254_s12 }
  0x18   : > { %p1256_p13 = pneg %p1524_p11  ;;  %p1264_p10 = por %p1263_p7, %p1262_p5 }
  0x1a   : > { %p1257_p0 = pnand %p1256_p13, %p1255_p12 }
  0x1c   : > { %p1258_p3 = pneg %p1257_p0 }
  0x1e   : > { %p1265_p9 = pnand %p1264_p10, %p1258_p3 }
  0x20   : > { %1268 = shalt.err (!%p1265_p9)
}
  0x21   : > { %s1417_s13 = smov [#allocation8]   ;;  %s1269_s14 = scalar_lea.vmem %s172_s7, 16 }
  0x22   : > { %1175 = dma.vmem_to_smem (!%p1524_p11), %s183_s29, 16, %s1417_s13, [#allocation9]  }
  0x23   : > { %p1270_p6 = scmp.ne.s32.totalorder %s172_s7, %s1269_s14  ;;  %p1277_p8 = scmp.lt.s32.totalorder %s172_s7, %s172_s7 }
  0x24   : > { %p1278_p2 = scmp.lt.s32.totalorder %s1269_s14, %s1269_s14 }
  0x25   : > { %p1272_p1 = pnand %p1270_p6, %p1256_p13 }
  0x26   : > { %p1279_p12 = por %p1278_p2, %p1277_p8 }
  0x27   : > { %p1273_p4 = pneg %p1272_p1 }
  0x29   : > { %p1280_p0 = pnand %p1279_p12, %p1273_p4 }
  0x2b   : > { %1283 = shalt.err (!%p1280_p0)
}
  0x2c   : > { %s1418_s21 = smov [#allocation7]   ;;  %s1284_s22 = scalar_lea.vmem %s1531_s11, 16 }
  0x2d   : > { %1172 = dma.vmem_to_smem (!%p1524_p11), %s172_s7, 16, %s1418_s21, [#allocation6]  }
  0x2e   : > { %p1285_p9 = scmp.ne.s32.totalorder %s1531_s11, %s1284_s22  ;;  %p1292_p1 = scmp.lt.s32.totalorder %s1531_s11, %s1531_s11 }
  0x2f   : > { %p1293_p5 = scmp.lt.s32.totalorder %s1284_s22, %s1284_s22 }
  0x30   : > { %p1287_p3 = pnand %p1285_p9, %p1256_p13 }
  0x31   : > { %p1294_p2 = por %p1293_p5, %p1292_p1 }
  0x32   : > { %p1288_p6 = pneg %p1287_p3 }
  0x34   : > { %p1295_p4 = pnand %p1294_p2, %p1288_p6 }
  0x36   : > { %1298 = shalt.err (!%p1295_p4)
}
  0x37   : > { %s1419_s27 = smov [#allocation10]   ;;  %s43_s28 = sadd.s32 1, %s1403_s17 }
  0x38   : > { %1178 = dma.vmem_to_smem (!%p1524_p11), %s1531_s11, 16, %s1419_s27, [#allocation9]  }
  0x39   : > { %s34_s29 = sadd.s32 1, %s1411_s19  ;;  %p50_p8 = scmp.ne.s32.totalorder %s1403_s17, %s1399_s16 }
  0x3a   : > { %p36_p13 = scmp.ge.s32.totalorder %s34_s29, 2  ;;  %p51_p7 = scmp.eq.s32.totalorder %s1415_s20, 0 }
  0x3b   : > { %p2036_p10 = scmp.ne.s32.totalorder %s2031_s24, 0  ;;  %p1190_p0 = scmp.lt.s32.totalorder %s1415_s20, 2 }
  0x3c   : > { %s2050_s29 = smov (%p36_p13, %s34_s29), 0  ;;  %p52_p9 = por %p51_p7, %p50_p8 }
  0x3d   : > { %p1562_p12 = por %p2036_p10, %p50_p8  ;;  %s204_s6 = sand.u32 1, %s1403_s17  }
  0x3e   : > { %s38_s7 = ssub.s32 %s1411_s19, %s2050_s29  ;;  %s1072_s8 = sshll.u32 %s204_s6, 6 }
  0x3f   : > { %p41_p3 = scmp.eq.s32.totalorder %s38_s7, 0  ;;  %s1151_s9 = sshll.u32 %s1411_s19, 10 }
  0x40   : > { %s216_s24 = scalar_lea.hbm %s2021_s0, %s1151_s9  ;;  %s208_s13 = scalar_lea.vmem [#allocation3], %s1072_s8 }
  0x41   : > { %s1574_s10 = scalar_select %p41_p3, %s1403_s17, %s43_s28  }
  0x42   : > { %s217_s14 = sshll.u32 %s208_s13, 4  ;;  %p1581_p11 = pnand %p1190_p0, %p52_p9  ;;  %s218_s14 = int_to_ptr.vmem [resolvable:$true] %s217_s14 }
  0x43   : > { %s205_s22 = scalar_lea.sflag [#allocation4], %s204_s6  ;;  %s1312_s27 = scalar_lea.vmem %s218_s14, 1024 }
  0x44   : > { %p1301_p6 = pneg %p1581_p11  ;;  %p1313_p1 = scmp.ne.s32.totalorder %s218_s14, %s1312_s27 }
  0x45   : > { %s1420_s28 = smov [#allocation3]  }
  0x46   : > { %p1315_p5 = pnand %p1313_p1, %p1301_p6  ;;  %s1317_s7 = sshll.u32 %s1420_s28, 4  ;;  %s1318_s7 = int_to_ptr.vmem [resolvable:$false] %s1317_s7 }
  0x47   : > { %s1319_s9 = scalar_lea.vmem %s1318_s7, 2048  ;;  %p1320_p4 = scmp.lt.s32.totalorder %s218_s14, %s1318_s7 }
  0x48   : > { %p1316_p2 = pneg %p1315_p5  ;;  %p1321_p8 = scmp.lt.s32.totalorder %s1319_s9, %s1312_s27 }
  0x4a   : > { %p1322_p13 = por %p1321_p8, %p1320_p4 }
  0x4c   : > { %p1323_p7 = pnand %p1322_p13, %p1316_p2 }
  0x4e   : > { %1326 = shalt.err (!%p1323_p7)
}
  0x4f   : > { %s1421_s8 = smov 128   ;;  %s1422_s11 = smov 8  }
  0x50   : > { %1182 = dma.hbm_to_vmem [thread:$0]  (!%p1581_p11), %s216_s24, 1024, %s218_s14, %s205_s22, %s1421_s8, %s1421_s8, %s1422_s11  }
  0x51   : > { %p2039_p10 = scmp.ne.s32.totalorder %s2034_s30, 0 }
  0x52   : > { %s1592_s6 = sand.u32 (!%p2039_p10), 1, %s1399_s16   ;;  %p2040_p0 = scmp.ne.s32.totalorder (!%p2039_p10), %s2032_s25, 0 }
  0x53   : > { %229 = sbr.rel (%p2039_p10) target bundleno = 460 (0x1cc), region = 36  ;;  %s1076_s12 = sshll.u32 (!%p2039_p10), %s1592_s6, 6 }
  0x54   : > { %s232_s13 = scalar_lea.sflag (!%p2039_p10), [#allocation4], %s1592_s6  ;;  %s1598_s27 = scalar_lea.vmem (!%p2039_p10), [#allocation3], %s1076_s12 }
  0x58   : > { %1378 = dma.done.wait (%p2040_p0), %s232_s13, 1024  }
  0x59   : > { %1380 = vsyncadd (%p2040_p0), %s232_s13, 4294966272  ;;  %p2041_p9 = scmp.ne.s32.totalorder %s2030_s23, 0 }
  0x5b   : > { %1382 = dma.done.wait (%p2041_p9), [#allocation6], 16  }
  0x5c   : > { %1384 = vsyncadd (%p2041_p9), [#allocation6], 4294967280 }
  0x5d   : > { %1386 = dma.done.wait (%p2041_p9), [#allocation9], 32  }
  0x5e   : > { %1388 = vsyncadd (%p2041_p9), [#allocation9], 4294967264 }
  0x5f   : > { %252 = sfence }
  0x60   : > { %v1613_v0 = vld [vmem:[%s1598_s27] sm:$0xff]  ;;  %v1616_v1 = vld [vmem:[%s1598_s27 + $0x10] sm:$0xff]  ;;  %vm275_vm0 = vcmask 7168   ;;  %s1423_s25 = smov 1   ;;  %vm289_vm1 = vcmask 146568   ;;  %vm303_vm2 = vcmask 139264  }
  0x61   : > { %328 = vrot.lane.b32.xlu0 %v1613_v0, %s1423_s25  ;;  %332 = vrot.lane.b32.xlu1 %v1616_v1, %s1423_s25  ;;  %vm278_vm3 = vcmask 1024   ;;  %v1623_v2 = vld [vmem:[%s1598_s27 + $0x8] sm:$0xff]  ;;  %v1626_v3 = vld [vmem:[%s1598_s27 + $0x18] sm:$0xff]  ;;  %v1424_v4 = vmov 0.0   ;;  %vm292_vm4 = vcmask 140424   ;;  %vm352_vm5 = vcmask 138248  }
  0x62   : > { %276 = vst.msk [vmem:[#allocation2] sm:$0xff] %vm275_vm0, %v1424_v4  ;;  %277 = vst.msk [vmem:[#allocation2 + $0x8] sm:$0xff] %vm275_vm0, %v1424_v4  ;;  %v1661_v5 = vld [vmem:[%s1598_s27 + $0x20] sm:$0xff]  ;;  %v1664_v6 = vld [vmem:[%s1598_s27 + $0x28] sm:$0xff]  ;;  %s1081_s23 = sld [smem:[#allocation7 + $0x1]]  ;;  %s1425_s21 = smov 127  }
  0x63   : > { %280 = vst.msk [vmem:[#allocation2 + $0x18] sm:$0xff] %vm275_vm0, %v1424_v4  ;;  %281 = vst.msk [vmem:[#allocation2 + $0x20] sm:$0xff] %vm275_vm0, %v1424_v4  ;;  %v1671_v7 = vld [vmem:[%s1598_s27 + $0x30] sm:$0xff]  ;;  %v1674_v8 = vld [vmem:[%s1598_s27 + $0x38] sm:$0xff]  ;;  %s1682_s30 = sld [smem:[#allocation7 + $0x2]]  ;;  %s1426_s28 = smov 126  }
  0x64   : > { %283 = vst.msk [vmem:[#allocation2 + $0x30] sm:$0xff] %vm275_vm0, %v1424_v4  ;;  %284 = vst.msk [vmem:[#allocation2 + $0x38] sm:$0xff] %vm275_vm0, %v1424_v4  ;;  %s1684_s24 = sld [smem:[#allocation7 + $0xa]]  ;;  %vm886_vm6 = vcmask 130048  }
  0x65   : > { %286 = vst.msk [vmem:[#allocation2 + $0x48] sm:$0xff] %vm275_vm0, %v1424_v4  ;;  %287 = vst.msk [vmem:[#allocation2 + $0x50] sm:$0xff] %vm275_vm0, %v1424_v4  ;;  %330 = vrot.lane.b32.xlu0 %v1623_v2, %s1423_s25  ;;  %334 = vrot.lane.b32.xlu1 %v1626_v3, %s1423_s25  ;;  %s1694_s14 = sld [smem:[#allocation7 + $0xb]] }
  0x66   : > { %279 = vst.msk [vmem:[#allocation2 + $0x10] sm:$0x3] %vm278_vm3, %v1424_v4  ;;  %282 = vst.msk [vmem:[#allocation2 + $0x28] sm:$0x3] %vm278_vm3, %v1424_v4  ;;  %s1702_s22 = sld [smem:[#allocation7 + $0x13]] }
  0x67   : > { %285 = vst.msk [vmem:[#allocation2 + $0x40] sm:$0x3] %vm278_vm3, %v1424_v4  ;;  %288 = vst.msk [vmem:[#allocation2 + $0x58] sm:$0x3] %vm278_vm3, %v1424_v4  ;;  %s1107_s7 = sld [smem:[#allocation7 + $0x14]] }
  0x68   : > { %290 = vst.msk [vmem:[#allocation2] sm:$0xff] %vm289_vm1, %v1424_v4  ;;  %291 = vst.msk [vmem:[#allocation2 + $0x8] sm:$0xff] %vm289_vm1, %v1424_v4  ;;  %v368_v13 = vstv %s1081_s23  ;;  %s1119_s9 = sld [smem:[#allocation7 + $0x1c]] }
  0x69   : > { %294 = vst.msk [vmem:[#allocation2 + $0x18] sm:$0xff] %vm289_vm1, %v1424_v4  ;;  %295 = vst.msk [vmem:[#allocation2 + $0x20] sm:$0xff] %vm289_vm1, %v1424_v4  ;;  %336 = vrot.lane.b32.xlu0 %v1661_v5, %s1423_s25  ;;  %338 = vrot.lane.b32.xlu1 %v1664_v6, %s1423_s25  ;;  %v382_v18 = vstv %s1682_s30  ;;  %s1084_s8 = sld [smem:[#allocation7 + $0x4]] }
  0x6a   : > { %297 = vst.msk [vmem:[#allocation2 + $0x30] sm:$0xff] %vm289_vm1, %v1424_v4  ;;  %298 = vst.msk [vmem:[#allocation2 + $0x38] sm:$0xff] %vm289_vm1, %v1424_v4  ;;  %v491_v21 = vstv %s1684_s24  ;;  %s1096_s11 = sld [smem:[#allocation7 + $0xd]] }
  0x6b   : > { %300 = vst.msk [vmem:[#allocation2 + $0x48] sm:$0xff] %vm289_vm1, %v1424_v4  ;;  %301 = vst.msk [vmem:[#allocation2 + $0x50] sm:$0xff] %vm289_vm1, %v1424_v4  ;;  %v505_v29 = vstv %s1694_s14  ;;  %s1120_s13 = sld [smem:[#allocation7 + $0x1d]] }
  0x6c   : > { %293 = vst.msk [vmem:[#allocation2 + $0x10] sm:$0x3] %vm292_vm4, %v1424_v4  ;;  %296 = vst.msk [vmem:[#allocation2 + $0x28] sm:$0x3] %vm292_vm4, %v1424_v4  ;;  %v622_v31 = vstv %s1702_s22  ;;  %s1085_s27 = sld [smem:[#allocation7 + $0x5]] }
  0x6d   : > { %299 = vst.msk [vmem:[#allocation2 + $0x40] sm:$0x3] %vm292_vm4, %v1424_v4  ;;  %302 = vst.msk [vmem:[#allocation2 + $0x58] sm:$0x3] %vm292_vm4, %v1424_v4  ;;  %340 = vrot.lane.b32.xlu0 %v1671_v7, %s1423_s25  ;;  %342 = vrot.lane.b32.xlu1 %v1674_v8, %s1423_s25  ;;  %v636_v36 = vstv %s1107_s7  ;;  %s1097_s25 = sld [smem:[#allocation7 + $0xe]] }
  0x6e   : > { %304 = vst.msk [vmem:[#allocation2] sm:$0x1] %vm303_vm2, %v1424_v4  ;;  %305 = vst.msk [vmem:[#allocation2 + $0x18] sm:$0x1] %vm303_vm2, %v1424_v4  ;;  %v753_v41 = vstv %s1119_s9  ;;  %s1109_s23 = sld [smem:[#allocation7 + $0x16]] }
  0x6f   : > { %308 = vst.msk [vmem:[#allocation2 + $0x11] sm:$0x1] %vm303_vm2, %v1424_v4  ;;  %306 = vst.msk [vmem:[#allocation2 + $0x30] sm:$0x1] %vm303_vm2, %v1424_v4  ;;  %v404_v46 = vstv %s1084_s8  ;;  %s1110_s30 = sld [smem:[#allocation7 + $0x17]] }
  0x70   : > { %307 = vst.msk [vmem:[#allocation2 + $0x48] sm:$0x1] %vm303_vm2, %v1424_v4  ;;  %309 = vst.msk [vmem:[#allocation2 + $0x29] sm:$0x1] %vm303_vm2, %v1424_v4  ;;  %v527_v51 = vstv %s1096_s11  ;;  %s1122_s24 = sld [smem:[#allocation7 + $0x1f]] }
  0x71   : > { %310 = vst.msk [vmem:[#allocation2 + $0x41] sm:$0x1] %vm303_vm2, %v1424_v4  ;;  %311 = vst.msk [vmem:[#allocation2 + $0x59] sm:$0x1] %vm303_vm2, %v1424_v4  ;;  %v767_v55 = vstv %s1120_s13  ;;  %s1087_s14 = sld [smem:[#allocation7 + $0x7]] }
  0x72   : > { %v418_v58 = vstv %s1085_s27  ;;  %s1099_s22 = sld [smem:[#allocation7 + $0x10]] }
  0x73   : > { %v541_v61 = vstv %s1097_s25  ;;  %s1123_s7 = sld [smem:[#allocation7 + $0x20]] }
  0x74   : > { %s1088_s9 = sld [smem:[#allocation7 + $0x8]] }
  0x75   : > { %s1100_s8 = sld [smem:[#allocation7 + $0x11]] }
  0x76   : > { %s1112_s11 = sld [smem:[#allocation7 + $0x19]] }
  0x77   : > { %s1113_s13 = sld [smem:[#allocation7 + $0x1a]] }
  0x78   : > { %s1125_s27 = sld [smem:[#allocation7 + $0x22]] }
  0x79   : > { %s1126_s25 = sld [smem:[#allocation7 + $0x23]] }
  0xd3   : > { %v329_v9 = vpop.permute.xlu0 %328  ;;  %v333_v10 = vpop.permute.xlu1 %332 }
  0xd4   : > { %353 = vst.msk [vmem:[#allocation2 + $0x1] sm:$0xff] %vm352_vm5, %v329_v9  ;;  %355 = vst.msk [vmem:[#allocation2 + $0x19] sm:$0xff] %vm352_vm5, %v333_v10  ;;  %v658_v9 = vstv %s1109_s23  ;;  %s363_s23 = sld [smem:[#allocation7]] }
  0xd7   : > { %v331_v11 = vpop.permute.xlu0 %330  ;;  %v335_v12 = vpop.permute.xlu1 %334 }
  0xd8   : > { %354 = vst.msk [vmem:[#allocation2 + $0x9] sm:$0xff] %vm352_vm5, %v331_v11  ;;  %356 = vst.msk [vmem:[#allocation2 + $0x21] sm:$0xff] %vm352_vm5, %v335_v12 }
  0xdb   : > { %v1688_v14 = vld [vmem:[#allocation2] sm:$0xff]  ;;  %v337_v15 = vpop.permute.xlu0 %336  ;;  %v339_v16 = vpop.permute.xlu1 %338  ;;  %v1699_v20 = vld [vmem:[#allocation2 + $0x18] sm:$0xff] }
  0xdc   : > { %v369_v17 = vmul.f32 %v368_v13, %v1688_v14  ;;  %357 = vst.msk [vmem:[#allocation2 + $0x31] sm:$0xff] %vm352_vm5, %v337_v15  ;;  %358 = vst.msk [vmem:[#allocation2 + $0x39] sm:$0xff] %vm352_vm5, %v339_v16  ;;  %v383_v25 = vmul.f32 %v382_v18, %v1688_v14  ;;  %v492_v26 = vmul.f32 %v491_v21, %v1699_v20  ;;  %v1740_v45 = vld [vmem:[#allocation2 + $0x1] sm:$0xff]  ;;  %v1748_v50 = vld [vmem:[#allocation2 + $0x19] sm:$0xff] }
  0xdd   : > { %v506_v33 = vmul.f32 %v505_v29, %v1699_v20  ;;  %v405_v48 = vmul.f32 %v404_v46, %v1740_v45  ;;  %v528_v53 = vmul.f32 %v527_v51, %v1748_v50  ;;  %v419_v60 = vmul.f32 %v418_v58, %v1740_v45 }
  0xde   : > { %373 = vrot.lane.b32.xlu0 %v369_v17, %s1425_s21  ;;  %v542_v63 = vmul.f32 %v541_v61, %v1748_v50 }
  0xdf   : > { %v1697_v19 = vld [vmem:[#allocation2 + $0x8] sm:$0xff]  ;;  %v341_v22 = vpop.permute.xlu0 %340  ;;  %v343_v23 = vpop.permute.xlu1 %342  ;;  %v1712_v28 = vld [vmem:[#allocation2 + $0x20] sm:$0xff] }
  0xe0   : > { %v370_v24 = vmul.f32 %v368_v13, %v1697_v19  ;;  %359 = vst.msk [vmem:[#allocation2 + $0x49] sm:$0xff] %vm352_vm5, %v341_v22  ;;  %360 = vst.msk [vmem:[#allocation2 + $0x51] sm:$0xff] %vm352_vm5, %v343_v23  ;;  %v384_v27 = vmul.f32 %v382_v18, %v1697_v19  ;;  %v493_v32 = vmul.f32 %v491_v21, %v1712_v28  ;;  %v1746_v49 = vld [vmem:[#allocation2 + $0x9] sm:$0xff]  ;;  %v1754_v54 = vld [vmem:[#allocation2 + $0x21] sm:$0xff]  ;;  %v672_v13 = vstv %s1110_s30  ;;  %s1083_s30 = sld [smem:[#allocation7 + $0x3]] }
  0xe1   : > { %v507_v37 = vmul.f32 %v505_v29, %v1712_v28  ;;  %v406_v52 = vmul.f32 %v404_v46, %v1746_v49  ;;  %v529_v56 = vmul.f32 %v527_v51, %v1754_v54  ;;  %v420_v62 = vmul.f32 %v418_v58, %v1746_v49  ;;  %v1794_v29 = vld [vmem:[#allocation2 + $0xa] sm:$0xff] }
  0xe2   : > { %375 = vrot.lane.b32.xlu1 %v370_v24, %s1425_s21  ;;  %387 = vrot.lane.b32.xlu0 %v383_v25, %s1426_s28  ;;  %v543_v10 = vmul.f32 %v541_v61, %v1754_v54  ;;  %v789_v18 = vstv %s1122_s24  ;;  %v1788_v24 = vld [vmem:[#allocation2 + $0x2] sm:$0xff]  ;;  %v440_v25 = vstv %s1087_s14  ;;  %s1092_s24 = sld [smem:[#allocation7 + $0x9]] }
  0xe3   : > { %v1717_v30 = vld [vmem:[#allocation2 + $0x30] sm:$0xff]  ;;  %v1725_v35 = vld [vmem:[#allocation2 + $0x38] sm:$0xff]  ;;  %v577_v46 = vstv %s1100_s8  ;;  %v825_v61 = vstv %s1125_s27  ;;  %s1845_s14 = sld [smem:[#allocation7 + $0xc]] }
  0xe4   : > { %v623_v34 = vmul.f32 %v622_v31, %v1717_v30  ;;  %v624_v38 = vmul.f32 %v622_v31, %v1725_v35  ;;  %v637_v39 = vmul.f32 %v636_v36, %v1717_v30  ;;  %v638_v44 = vmul.f32 %v636_v36, %v1725_v35  ;;  %v1768_v4 = vld [vmem:[#allocation2 + $0x31] sm:$0xff]  ;;  %v1774_v12 = vld [vmem:[#allocation2 + $0x39] sm:$0xff]  ;;  %v1802_v36 = vld [vmem:[#allocation2 + $0x22] sm:$0xff]  ;;  %s1862_s8 = sld [smem:[#allocation7 + $0xf]] }
  0xe5   : > { %v659_v11 = vmul.f32 %v658_v9, %v1768_v4  ;;  %v660_v15 = vmul.f32 %v658_v9, %v1774_v12  ;;  %v673_v16 = vmul.f32 %v672_v13, %v1768_v4  ;;  %v674_v21 = vmul.f32 %v672_v13, %v1774_v12  ;;  %v1796_v31 = vld [vmem:[#allocation2 + $0x1a] sm:$0xff]  ;;  %v1816_v51 = vld [vmem:[#allocation2 + $0x32] sm:$0xff]  ;;  %s1879_s27 = sld [smem:[#allocation8]] }
  0xe6   : > { %389 = vrot.lane.b32.xlu1 %v384_v27, %s1426_s28  ;;  %496 = vrot.lane.b32.xlu0 %v492_v26, %s1425_s21  ;;  %v441_v27 = vmul.f32 %v440_v25, %v1788_v24 }
  0xe7   : > { %v1732_v40 = vld [vmem:[#allocation2 + $0x48] sm:$0xff]  ;;  %v1737_v43 = vld [vmem:[#allocation2 + $0x50] sm:$0xff] }
  0xe8   : > { %v754_v42 = vmul.f32 %v753_v41, %v1732_v40  ;;  %v755_v47 = vmul.f32 %v753_v41, %v1737_v43  ;;  %v768_v57 = vmul.f32 %v767_v55, %v1732_v40  ;;  %v769_v59 = vmul.f32 %v767_v55, %v1737_v43  ;;  %v1780_v17 = vld [vmem:[#allocation2 + $0x49] sm:$0xff]  ;;  %v1786_v23 = vld [vmem:[#allocation2 + $0x51] sm:$0xff] }
  0xe9   : > { %v790_v22 = vmul.f32 %v789_v18, %v1780_v17  ;;  %v791_v26 = vmul.f32 %v789_v18, %v1786_v23  ;;  %v454_v41 = vstv %s1088_s9  ;;  %v1834_v9 = vld [vmem:[#allocation2 + $0x52] sm:$0xff]  ;;  %s1859_s9 = sld [smem:[#allocation7 + $0x6]] }
  0xea   : > { %498 = vrot.lane.b32.xlu1 %v493_v32, %s1425_s21  ;;  %510 = vrot.lane.b32.xlu0 %v506_v33, %s1426_s28  ;;  %v563_v32 = vstv %s1099_s22  ;;  %v442_v33 = vmul.f32 %v440_v25, %v1794_v29  ;;  %v398_v25 = vstv %s1083_s30  ;;  %s1118_s22 = sld [smem:[#allocation7 + $0x1b]] }
  0xeb   : > { %s1885_s30 = sld [smem:[#allocation8 + $0x3]] }
  0xee   : > { %512 = vrot.lane.b32.xlu1 %v507_v37, %s1426_s28  ;;  %627 = vrot.lane.b32.xlu0 %v623_v34, %s1425_s21  ;;  %v564_v34 = vmul.f32 %v563_v32, %v1796_v31  ;;  %v803_v37 = vstv %s1123_s7  ;;  %s1121_s7 = sld [smem:[#allocation7 + $0x1e]] }
  0xf2   : > { %629 = vrot.lane.b32.xlu1 %v624_v38, %s1425_s21  ;;  %641 = vrot.lane.b32.xlu0 %v637_v39, %s1426_s28  ;;  %v565_v38 = vmul.f32 %v563_v32, %v1802_v36  ;;  %v804_v39 = vmul.f32 %v803_v37, %v1780_v17 }
  0xf6   : > { %643 = vrot.lane.b32.xlu1 %v638_v44, %s1426_s28  ;;  %758 = vrot.lane.b32.xlu0 %v754_v42, %s1425_s21  ;;  %v805_v42 = vmul.f32 %v803_v37, %v1786_v23  ;;  %v455_v44 = vmul.f32 %v454_v41, %v1788_v24 }
  0xfa   : > { %760 = vrot.lane.b32.xlu1 %v755_v47, %s1425_s21  ;;  %409 = vrot.lane.b32.xlu0 %v405_v48, %s1425_s21  ;;  %v456_v47 = vmul.f32 %v454_v41, %v1794_v29  ;;  %v578_v48 = vmul.f32 %v577_v46, %v1796_v31 }
  0xfe   : > { %411 = vrot.lane.b32.xlu1 %v406_v52, %s1425_s21  ;;  %532 = vrot.lane.b32.xlu0 %v528_v53, %s1425_s21  ;;  %v694_v52 = vstv %s1112_s11  ;;  %v579_v53 = vmul.f32 %v577_v46, %v1802_v36  ;;  %s1111_s11 = sld [smem:[#allocation7 + $0x18]] }
  0xff   : > { %v695_v55 = vmul.f32 %v694_v52, %v1816_v51 }
 0x102   : > { %534 = vrot.lane.b32.xlu1 %v529_v56, %s1425_s21  ;;  %772 = vrot.lane.b32.xlu0 %v768_v57, %s1426_s28  ;;  %v1822_v56 = vld [vmem:[#allocation2 + $0x3a] sm:$0xff]  ;;  %v708_v57 = vstv %s1113_s13  ;;  %s1124_s13 = sld [smem:[#allocation7 + $0x21]] }
 0x103   : > { %v696_v58 = vmul.f32 %v694_v52, %v1822_v56 }
 0x106   : > { %774 = vrot.lane.b32.xlu1 %v769_v59, %s1426_s28  ;;  %423 = vrot.lane.b32.xlu0 %v419_v60, %s1426_s28  ;;  %v709_v59 = vmul.f32 %v708_v57, %v1816_v51  ;;  %v1828_v60 = vld [vmem:[#allocation2 + $0x4a] sm:$0xff] }
 0x10a   : > { %425 = vrot.lane.b32.xlu1 %v420_v62, %s1426_s28  ;;  %546 = vrot.lane.b32.xlu0 %v542_v63, %s1426_s28  ;;  %v710_v62 = vmul.f32 %v708_v57, %v1822_v56  ;;  %v826_v63 = vmul.f32 %v825_v61, %v1828_v60 }
 0x10e   : > { %548 = vrot.lane.b32.xlu1 %v543_v10, %s1426_s28  ;;  %663 = vrot.lane.b32.xlu0 %v659_v11, %s1425_s21  ;;  %v839_v10 = vstv %s1126_s25  ;;  %v827_v11 = vmul.f32 %v825_v61, %v1834_v9  ;;  %s1881_s25 = sld [smem:[#allocation8 + $0x1]] }
 0x10f   : > { %v840_v13 = vmul.f32 %v839_v10, %v1828_v60 }
 0x112   : > { %665 = vrot.lane.b32.xlu1 %v660_v15, %s1425_s21  ;;  %677 = vrot.lane.b32.xlu0 %v673_v16, %s1426_s28  ;;  %v841_v15 = vmul.f32 %v839_v10, %v1834_v9  ;;  %v364_v16 = vstv %s363_s23  ;;  %s1883_s23 = sld [smem:[#allocation8 + $0x2]] }
 0x113   : > { %v365_v18 = vmul.f32 %v364_v16, %v1688_v14 }
 0x116   : > { %679 = vrot.lane.b32.xlu1 %v674_v21, %s1426_s28  ;;  %794 = vrot.lane.b32.xlu0 %v790_v22, %s1425_s21 }
 0x11a   : > { %796 = vrot.lane.b32.xlu1 %v791_v26, %s1425_s21  ;;  %445 = vrot.lane.b32.xlu0 %v441_v27, %s1425_s21  ;;  %v366_v26 = vmul.f32 %v364_v16, %v1697_v19 }
 0x11e   : > { %447 = vrot.lane.b32.xlu1 %v442_v33, %s1425_s21  ;;  %568 = vrot.lane.b32.xlu0 %v564_v34, %s1425_s21  ;;  %v487_v33 = vstv %s1092_s24  ;;  %s1887_s24 = sld [smem:[#allocation8 + $0x4]] }
 0x11f   : > { %v489_v19 = vmul.f32 %v487_v33, %v1712_v28 }
 0x122   : > { %570 = vrot.lane.b32.xlu1 %v565_v38, %s1425_s21  ;;  %808 = vrot.lane.b32.xlu0 %v804_v39, %s1426_s28  ;;  %v399_v38 = vmul.f32 %v398_v25, %v1740_v45  ;;  %v488_v39 = vmul.f32 %v487_v33, %v1699_v20 }
 0x126   : > { %810 = vrot.lane.b32.xlu1 %v805_v42, %s1426_s28  ;;  %459 = vrot.lane.b32.xlu0 %v455_v44, %s1426_s28 }
 0x12a   : > { %461 = vrot.lane.b32.xlu1 %v456_v47, %s1426_s28  ;;  %582 = vrot.lane.b32.xlu0 %v578_v48, %s1426_s28  ;;  %v400_v47 = vmul.f32 %v398_v25, %v1746_v49  ;;  %v521_v48 = vstv %s1845_s14  ;;  %s1889_s14 = sld [smem:[#allocation8 + $0x5]] }
 0x12b   : > { %v522_v45 = vmul.f32 %v521_v48, %v1748_v50  ;;  %v523_v49 = vmul.f32 %v521_v48, %v1754_v54  ;;  %v434_v48 = vstv %s1859_s9  ;;  %s1906_s9 = sld [smem:[#allocation8 + $0xa]] }
 0x12e   : > { %584 = vrot.lane.b32.xlu1 %v579_v53, %s1426_s28  ;;  %699 = vrot.lane.b32.xlu0 %v695_v55, %s1425_s21 }
 0x132   : > { %701 = vrot.lane.b32.xlu1 %v696_v58, %s1425_s21  ;;  %713 = vrot.lane.b32.xlu0 %v709_v59, %s1426_s28 }
 0x136   : > { %715 = vrot.lane.b32.xlu1 %v710_v62, %s1426_s28  ;;  %830 = vrot.lane.b32.xlu0 %v826_v63, %s1425_s21 }
 0x13a   : > { %832 = vrot.lane.b32.xlu1 %v827_v11, %s1425_s21  ;;  %844 = vrot.lane.b32.xlu0 %v840_v13, %s1426_s28  ;;  %s1105_s21 = sld [smem:[#allocation7 + $0x12]] }
 0x13e   : > { %846 = vrot.lane.b32.xlu1 %v841_v15, %s1426_s28  ;;  %s1108_s28 = sld [smem:[#allocation7 + $0x15]] }
 0x140   : > { %v618_v59 = vstv %s1105_s21  ;;  %s1891_s21 = sld [smem:[#allocation8 + $0x6]] }
 0x141   : > { %v619_v10 = vmul.f32 %v618_v59, %v1717_v30 }
 0x144   : > { %v652_v11 = vstv %s1108_s28  ;;  %s1893_s28 = sld [smem:[#allocation8 + $0x7]] }
 0x145   : > { %v654_v30 = vmul.f32 %v652_v11, %v1774_v12 }
 0x150   : > { %v374_v21 = vpop.permute.xlu0 %373 }
 0x151   : > { %v379_v22 = vadd.f32 %v374_v21, %v365_v18  ;;  %v620_v18 = vmul.f32 %v618_v59, %v1725_v35 }
 0x154   : > { %v376_v27 = vpop.permute.xlu1 %375  ;;  %v388_v32 = vpop.permute.xlu0 %387 }
 0x155   : > { %v380_v34 = vadd.f32 %v376_v27, %v366_v26  ;;  %v393_v37 = vadd.f32 %v388_v32, %v379_v22  ;;  %v653_v22 = vmul.f32 %v652_v11, %v1768_v4 }
 0x157   : > { %v401_v41 = vadd.f32 %v399_v38, %v393_v37  ;;  %v749_v37 = vstv %s1118_s22  ;;  %s1896_s22 = sld [smem:[#allocation8 + $0x8]] }
 0x158   : > { %v390_v14 = vpop.permute.xlu1 %389  ;;  %v497_v42 = vpop.permute.xlu0 %496  ;;  %v750_v4 = vmul.f32 %v749_v37, %v1732_v40  ;;  %v751_v12 = vmul.f32 %v749_v37, %v1737_v43 }
 0x159   : > { %v394_v44 = vadd.f32 %v390_v14, %v380_v34  ;;  %v502_v46 = vadd.f32 %v497_v42, %v488_v39  ;;  %v783_v39 = vstv %s1121_s7  ;;  %s1901_s7 = sld [smem:[#allocation8 + $0x9]] }
 0x15a   : > { %v785_v59 = vmul.f32 %v783_v39, %v1786_v23 }
 0x15b   : > { %v402_v52 = vadd.f32 %v400_v47, %v394_v44  ;;  %v784_v47 = vmul.f32 %v783_v39, %v1780_v17 }
 0x15c   : > { %v499_v53 = vpop.permute.xlu1 %498  ;;  %v511_v55 = vpop.permute.xlu0 %510 }
 0x15d   : > { %v503_v57 = vadd.f32 %v499_v53, %v489_v19  ;;  %v516_v58 = vadd.f32 %v511_v55, %v502_v46 }
 0x15f   : > { %v524_v20 = vadd.f32 %v522_v45, %v516_v58 }
 0x160   : > { %v513_v61 = vpop.permute.xlu1 %512  ;;  %v628_v62 = vpop.permute.xlu0 %627 }
 0x161   : > { %v517_v63 = vadd.f32 %v513_v61, %v503_v57  ;;  %v633_v13 = vadd.f32 %v628_v62, %v619_v10  ;;  %v435_v61 = vmul.f32 %v434_v48, %v1788_v24  ;;  %v557_v62 = vstv %s1862_s8  ;;  %s1911_s8 = sld [smem:[#allocation8 + $0xb]] }
 0x163   : > { %v525_v15 = vadd.f32 %v523_v49, %v517_v63 }
 0x164   : > { %v630_v28 = vpop.permute.xlu1 %629  ;;  %v642_v16 = vpop.permute.xlu0 %641 }
 0x165   : > { %v647_v21 = vadd.f32 %v642_v16, %v633_v13  ;;  %v634_v50 = vadd.f32 %v630_v28, %v620_v18  ;;  %v558_v16 = vmul.f32 %v557_v62, %v1796_v31 }
 0x167   : > { %v655_v25 = vadd.f32 %v653_v22, %v647_v21 }
 0x168   : > { %v644_v26 = vpop.permute.xlu1 %643  ;;  %v759_v27 = vpop.permute.xlu0 %758 }
 0x169   : > { %v648_v32 = vadd.f32 %v644_v26, %v634_v50  ;;  %v764_v14 = vadd.f32 %v759_v27, %v750_v4  ;;  %v559_v26 = vmul.f32 %v557_v62, %v1802_v36  ;;  %v480_v62 = vstv %s1885_s30  ;;  %s1933_s30 = sld [smem:[#allocation10 + $0x1]] }
 0x16b   : > { %v656_v54 = vadd.f32 %v654_v30, %v648_v32 }
 0x16c   : > { %v761_v33 = vpop.permute.xlu1 %760  ;;  %v410_v34 = vpop.permute.xlu0 %409 }
 0x16d   : > { %v765_v19 = vadd.f32 %v761_v33, %v751_v12  ;;  %v415_v53 = vadd.f32 %v410_v34, %v401_v41  ;;  %v436_v41 = vmul.f32 %v434_v48, %v1794_v29 }
 0x170   : > { %v412_v35 = vpop.permute.xlu1 %411  ;;  %v533_v38 = vpop.permute.xlu0 %532 }
 0x171   : > { %v416_v63 = vadd.f32 %v412_v35, %v402_v52  ;;  %v538_v10 = vadd.f32 %v533_v38, %v524_v20  ;;  %v688_v52 = vstv %s1111_s11  ;;  %s1918_s11 = sld [smem:[#allocation8 + $0xc]] }
 0x172   : > { %v689_v34 = vmul.f32 %v688_v52, %v1816_v51  ;;  %v690_v38 = vmul.f32 %v688_v52, %v1822_v56  ;;  %v819_v51 = vstv %s1124_s13  ;;  %s1920_s13 = sld [smem:[#allocation8 + $0xd]] }
 0x173   : > { %v820_v12 = vmul.f32 %v819_v51, %v1828_v60  ;;  %v821_v60 = vmul.f32 %v819_v51, %v1834_v9 }
 0x174   : > { %v535_v42 = vpop.permute.xlu1 %534  ;;  %v773_v44 = vpop.permute.xlu0 %772 }
 0x175   : > { %v778_v46 = vadd.f32 %v773_v44, %v764_v14  ;;  %v539_v18 = vadd.f32 %v535_v42, %v525_v15 }
 0x177   : > { %v786_v55 = vadd.f32 %v784_v47, %v778_v46 }
 0x178   : > { %v775_v57 = vpop.permute.xlu1 %774  ;;  %v424_v58 = vpop.permute.xlu0 %423 }
 0x179   : > { %v779_v45 = vadd.f32 %v775_v57, %v765_v19  ;;  %v429_v40 = vadd.f32 %v424_v58, %v415_v53  ;;  %v468_v57 = vstv %s1879_s27  ;;  %s1922_s27 = sld [smem:[#allocation8 + $0xe]] }
 0x17b   : > { %v787_v43 = vadd.f32 %v785_v59, %v779_v45  ;;  %v437_v49 = vadd.f32 %v435_v61, %v429_v40  ;;  %v472_v59 = vstv %s1881_s25  ;;  %v476_v61 = vstv %s1883_s23  ;;  %s1928_s25 = sld [smem:[#allocation8 + $0xf]] }
 0x17c   : > { %v426_v11 = vpop.permute.xlu1 %425  ;;  %v547_v17 = vpop.permute.xlu0 %546  ;;  %s1930_s23 = sld [smem:[#allocation10]] }
 0x17d   : > { %v430_v13 = vadd.f32 %v426_v11, %v416_v63  ;;  %v552_v28 = vadd.f32 %v547_v17, %v538_v10  ;;  %v591_v10 = vstv %s1887_s24  ;;  %s1935_s24 = sld [smem:[#allocation10 + $0x2]] }
 0x17f   : > { %v438_v21 = vadd.f32 %v436_v41, %v430_v13  ;;  %v560_v22 = vadd.f32 %v558_v16, %v552_v28  ;;  %v603_v13 = vstv %s1891_s21  ;;  %v609_v28 = vstv %s1893_s28  ;;  %s1152_s21 = sshll.u32 %s1407_s18, 10  ;;  %s272_s28 = scalar_lea.vmem [#allocation11], %s1076_s12 }
 0x180   : > { %v549_v23 = vpop.permute.xlu1 %548  ;;  %v664_v50 = vpop.permute.xlu0 %663 }
 0x181   : > { %v553_v24 = vadd.f32 %v549_v23, %v539_v18  ;;  %v669_v20 = vadd.f32 %v664_v50, %v655_v25  ;;  %v722_v18 = vstv %s1896_s22  ;;  %s947_s22 = sshll.u32 %s272_s28, 4  ;;  %s1969_s22 = int_to_ptr.vmem [resolvable:$true] %s947_s22 }
 0x183   : > { %v561_v27 = vadd.f32 %v559_v26, %v553_v24 }
 0x184   : > { %v666_v32 = vpop.permute.xlu1 %665  ;;  %v678_v30 = vpop.permute.xlu0 %677 }
 0x185   : > { %v683_v33 = vadd.f32 %v678_v30, %v669_v20  ;;  %v670_v37 = vadd.f32 %v666_v32, %v656_v54 }
 0x187   : > { %v1874_v29 = vadd.f32 %v689_v34, %v683_v33 }
 0x188   : > { %v680_v31 = vpop.permute.xlu1 %679  ;;  %v795_v15 = vpop.permute.xlu0 %794 }
 0x189   : > { %v684_v35 = vadd.f32 %v680_v31, %v670_v37  ;;  %v800_v56 = vadd.f32 %v795_v15, %v786_v55 }
 0x18b   : > { %v1877_v4 = vadd.f32 %v690_v38, %v684_v35 }
 0x18c   : > { %v797_v36 = vpop.permute.xlu1 %796  ;;  %v446_v39 = vpop.permute.xlu0 %445 }
 0x18d   : > { %v801_v46 = vadd.f32 %v797_v36, %v787_v43  ;;  %v451_v48 = vadd.f32 %v446_v39, %v437_v49  ;;  %v597_v43 = vstv %s1889_s14  ;;  %s1938_s14 = sld [smem:[#allocation10 + $0x3]] }
 0x190   : > { %v448_v25 = vpop.permute.xlu1 %447  ;;  %v569_v14 = vpop.permute.xlu0 %568 }
 0x191   : > { %v452_v45 = vadd.f32 %v448_v25, %v438_v21  ;;  %v574_v40 = vadd.f32 %v569_v14, %v560_v22 }
 0x194   : > { %v571_v54 = vpop.permute.xlu1 %570  ;;  %v809_v42 = vpop.permute.xlu0 %808 }
 0x195   : > { %v814_v44 = vadd.f32 %v809_v42, %v800_v56  ;;  %v575_v41 = vadd.f32 %v571_v54, %v561_v27  ;;  %v728_v54 = vstv %s1901_s7  ;;  %v734_v42 = vstv %s1906_s9  ;;  %s1967_s7 = scalar_lea.hbm %s2025_s4, %s1152_s21  ;;  %s932_s9 = scalar_lea.sflag [#allocation5], %s1592_s6 }
 0x197   : > { %v1898_v47 = vadd.f32 %v820_v12, %v814_v44  ;;  %v740_v44 = vstv %s1911_s8  ;;  %s1327_s8 = scalar_lea.vmem %s1969_s22, 1024 }
 0x198   : > { %v811_v19 = vpop.permute.xlu1 %810  ;;  %v460_v53 = vpop.permute.xlu0 %459  ;;  %p1328_p3 = scmp.ne.s32.totalorder %s1969_s22, %s1327_s8 }
 0x199   : > { %v815_v55 = vadd.f32 %v811_v19, %v801_v46  ;;  %v465_v58 = vadd.f32 %v460_v53, %v451_v48 }
 0x19a   : > { %p1329_p11 = pnand %p1328_p3, %p1562_p12 }
 0x19b   : > { %v1913_v11 = vadd.f32 %v821_v60, %v815_v55  ;;  %v469_v16 = vmul.f32 %v468_v57, %v465_v58  ;;  %v473_v21 = vmul.f32 %v472_v59, %v465_v58  ;;  %v477_v22 = vmul.f32 %v476_v61, %v465_v58 }
 0x19c   : > { %v462_v63 = vpop.permute.xlu1 %461  ;;  %v583_v49 = vpop.permute.xlu0 %582  ;;  %v481_v23 = vmul.f32 %v480_v62, %v465_v58  ;;  %p1330_p6 = pneg %p1329_p11 }
 0x19d   : > { %v466_v17 = vadd.f32 %v462_v63, %v452_v45  ;;  %v588_v9 = vadd.f32 %v583_v49, %v574_v40 }
 0x19f   : > { %v470_v50 = vmul.f32 %v468_v57, %v466_v17  ;;  %v592_v24 = vmul.f32 %v591_v10, %v588_v9  ;;  %v598_v26 = vmul.f32 %v597_v43, %v588_v9  ;;  %v604_v52 = vmul.f32 %v603_v13, %v588_v9 }
 0x1a0   : > { %v610_v20 = vmul.f32 %v609_v28, %v588_v9  ;;  %v585_v32 = vpop.permute.xlu1 %584  ;;  %v700_v30 = vpop.permute.xlu0 %699  ;;  %v474_v33 = vmul.f32 %v472_v59, %v466_v17  ;;  %v478_v34 = vmul.f32 %v476_v61, %v466_v17  ;;  %v482_v37 = vmul.f32 %v480_v62, %v466_v17 }
 0x1a1   : > { %v589_v31 = vadd.f32 %v585_v32, %v575_v41  ;;  %v594_v27 = vadd.f32 %v592_v24, %v469_v16  ;;  %v600_v15 = vadd.f32 %v598_v26, %v473_v21  ;;  %v606_v35 = vadd.f32 %v604_v52, %v477_v22 }
 0x1a2   : > { %v612_v38 = vadd.f32 %v610_v20, %v481_v23  ;;  %v705_v51 = vadd.f32 %v700_v30, %v1874_v29  ;;  %v853_v62 = vstv %s1918_s11  ;;  %v859_v16 = vstv %s1920_s13  ;;  %s1427_s11 = smov [#allocation11]  }
 0x1a3   : > { %v593_v36 = vmul.f32 %v591_v10, %v589_v31  ;;  %v599_v39 = vmul.f32 %v597_v43, %v589_v31  ;;  %v605_v25 = vmul.f32 %v603_v13, %v589_v31  ;;  %v611_v14 = vmul.f32 %v609_v28, %v589_v31  ;;  %s1331_s13 = sshll.u32 %s1427_s11, 4  ;;  %s1332_s13 = int_to_ptr.vmem [resolvable:$false] %s1331_s13 }
 0x1a4   : > { %v702_v56 = vpop.permute.xlu1 %701  ;;  %v714_v12 = vpop.permute.xlu0 %713  ;;  %v865_v21 = vstv %s1922_s27  ;;  %v871_v22 = vstv %s1928_s25  ;;  %v877_v32 = vstv %s1930_s23  ;;  %v890_v31 = vstv %s1933_s30  ;;  %s1333_s27 = scalar_lea.vmem %s1332_s13, 2048  ;;  %p1334_p1 = scmp.lt.s32.totalorder %s1969_s22, %s1332_s13 }
 0x1a5   : > { %v595_v46 = vadd.f32 %v593_v36, %v470_v50  ;;  %v601_v48 = vadd.f32 %v599_v39, %v474_v33  ;;  %v607_v19 = vadd.f32 %v605_v25, %v478_v34  ;;  %v613_v53 = vadd.f32 %v611_v14, %v482_v37  ;;  %p1335_p5 = scmp.lt.s32.totalorder %s1333_s27, %s1327_s8 }
 0x1a6   : > { %v719_v55 = vadd.f32 %v714_v12, %v705_v51  ;;  %v706_v57 = vadd.f32 %v702_v56, %v1877_v4 }
 0x1a7   : > { %p1336_p2 = por %p1335_p5, %p1334_p1 }
 0x1a8   : > { %v723_v29 = vmul.f32 %v722_v18, %v719_v55  ;;  %v729_v58 = vmul.f32 %v728_v54, %v719_v55  ;;  %v735_v60 = vmul.f32 %v734_v42, %v719_v55  ;;  %v741_v45 = vmul.f32 %v740_v44, %v719_v55  ;;  %v716_v40 = vpop.permute.xlu1 %715  ;;  %v831_v59 = vpop.permute.xlu0 %830 }
 0x1a9   : > { %v720_v61 = vadd.f32 %v716_v40, %v706_v57  ;;  %v836_v9 = vadd.f32 %v831_v59, %v1898_v47  ;;  %p1337_p4 = pnand %p1336_p2, %p1330_p6 }
 0x1aa   : > { %v725_v63 = vadd.f32 %v723_v29, %v594_v27  ;;  %v731_v10 = vadd.f32 %v729_v58, %v600_v15  ;;  %v737_v4 = vadd.f32 %v735_v60, %v606_v35  ;;  %v743_v43 = vadd.f32 %v741_v45, %v612_v38 }
 0x1ab   : > { %v724_v49 = vmul.f32 %v722_v18, %v720_v61  ;;  %v730_v17 = vmul.f32 %v728_v54, %v720_v61  ;;  %v736_v13 = vmul.f32 %v734_v42, %v720_v61  ;;  %v742_v28 = vmul.f32 %v740_v44, %v720_v61 }
 0x1ac   : > { %v833_v41 = vpop.permute.xlu1 %832  ;;  %v845_v23 = vpop.permute.xlu0 %844  ;;  %v904_v27 = vstv %s1935_s24  ;;  %v918_v15 = vstv %s1938_s14 }
 0x1ad   : > { %v726_v50 = vadd.f32 %v724_v49, %v595_v46  ;;  %v732_v24 = vadd.f32 %v730_v17, %v601_v48  ;;  %v738_v26 = vadd.f32 %v736_v13, %v607_v19  ;;  %v744_v52 = vadd.f32 %v742_v28, %v613_v53 }
 0x1ae   : > { %v850_v20 = vadd.f32 %v845_v23, %v836_v9  ;;  %v837_v18 = vadd.f32 %v833_v41, %v1913_v11 }
 0x1b0   : > { %v854_v30 = vmul.f32 %v853_v62, %v850_v20  ;;  %v860_v33 = vmul.f32 %v859_v16, %v850_v20  ;;  %v866_v47 = vmul.f32 %v865_v21, %v850_v20  ;;  %v872_v34 = vmul.f32 %v871_v22, %v850_v20  ;;  %v847_v37 = vpop.permute.xlu1 %846 }
 0x1b1   : > { %v851_v35 = vadd.f32 %v847_v37, %v837_v18 }
 0x1b2   : > { %v856_v38 = vadd.f32 %v854_v30, %v725_v63  ;;  %v862_v36 = vadd.f32 %v860_v33, %v731_v10  ;;  %v868_v39 = vadd.f32 %v866_v47, %v737_v4  ;;  %v874_v25 = vadd.f32 %v872_v34, %v743_v43 }
 0x1b3   : > { %v855_v14 = vmul.f32 %v853_v62, %v851_v35  ;;  %v861_v51 = vmul.f32 %v859_v16, %v851_v35  ;;  %v867_v56 = vmul.f32 %v865_v21, %v851_v35  ;;  %v873_v54 = vmul.f32 %v871_v22, %v851_v35 }
 0x1b4   : > { %v878_v11 = vadd.f32 %v877_v32, %v856_v38  ;;  %v891_v42 = vadd.f32 %v890_v31, %v862_v36  ;;  %v905_v44 = vadd.f32 %v904_v27, %v868_v39  ;;  %v919_v12 = vadd.f32 %v918_v15, %v874_v25 }
 0x1b5   : > { %v857_v46 = vadd.f32 %v855_v14, %v726_v50  ;;  %v863_v48 = vadd.f32 %v861_v51, %v732_v24  ;;  %v869_v19 = vadd.f32 %v867_v56, %v738_v26  ;;  %v875_v53 = vadd.f32 %v873_v54, %v744_v52 }
 0x1b6   : > { %v882_v55 = vadd.f32 %v878_v11, %v1613_v0  ;;  %v896_v57 = vadd.f32 %v891_v42, %v1616_v1  ;;  %v910_v29 = vadd.f32 %v905_v44, %v1661_v5  ;;  %v924_v58 = vadd.f32 %v919_v12, %v1671_v7 }
 0x1b7   : > { %v879_v60 = vadd.f32 %v877_v32, %v857_v46  ;;  %v892_v45 = vadd.f32 %v890_v31, %v863_v48  ;;  %v906_v40 = vadd.f32 %v904_v27, %v869_v19  ;;  %v920_v59 = vadd.f32 %v918_v15, %v875_v53 }
 0x1b8   : > { %v884_v61 = vmax.f32 %v882_v55, 0.0  ;;  %v898_v62 = vmax.f32 %v896_v57, 0.0  ;;  %v912_v63 = vmax.f32 %v910_v29, 0.0  ;;  %v926_v10 = vmax.f32 %v924_v58, 0.0 }
 0x1b9   : > { %v883_v0 = vadd.f32 %v879_v60, %v1623_v2  ;;  %v897_v1 = vadd.f32 %v892_v45, %v1626_v3  ;;  %v911_v5 = vadd.f32 %v906_v40, %v1664_v6  ;;  %v925_v7 = vadd.f32 %v920_v59, %v1674_v8 }
 0x1ba   : > { %887 = vst.msk [vmem:[%s272_s28] sm:$0xff] %vm886_vm6, %v884_v61  ;;  %1134 = vst.msk [vmem:[%s272_s28 + $0x10] sm:$0xff] %vm886_vm6, %v898_v62 }
 0x1bb   : > { %1139 = vst.msk [vmem:[%s272_s28 + $0x20] sm:$0xff] %vm886_vm6, %v912_v63  ;;  %1144 = vst.msk [vmem:[%s272_s28 + $0x30] sm:$0xff] %vm886_vm6, %v926_v10  ;;  %v885_v2 = vmax.f32 %v883_v0, 0.0  ;;  %v899_v3 = vmax.f32 %v897_v1, 0.0  ;;  %v913_v6 = vmax.f32 %v911_v5, 0.0  ;;  %v927_v8 = vmax.f32 %v925_v7, 0.0 }
 0x1bd   : > { %888 = vst.msk [vmem:[%s272_s28 + $0x8] sm:$0xff] %vm886_vm6, %v885_v2  ;;  %1135 = vst.msk [vmem:[%s272_s28 + $0x18] sm:$0xff] %vm886_vm6, %v899_v3 }
 0x1be   : > { %1140 = vst.msk [vmem:[%s272_s28 + $0x28] sm:$0xff] %vm886_vm6, %v913_v6  ;;  %1145 = vst.msk [vmem:[%s272_s28 + $0x38] sm:$0xff] %vm886_vm6, %v927_v8 }
 0x1bf   : > { %1340 = shalt.err (!%p1337_p4)
}
 0x1c0   : > { %s1341_s25 = scalar_lea.hbm %s1967_s7, 1024  ;;  %s1345_s24 = scalar_lea.hbm %s2025_s4, 2048 }
 0x1c1   : > { %p1342_p8 = scmp.ne.s32.totalorder %s1967_s7, %s1341_s25  ;;  %p1346_p10 = scmp.lt.s32.totalorder %s1967_s7, %s2025_s4 }
 0x1c2   : > { %p1347_p0 = scmp.lt.s32.totalorder %s1345_s24, %s1341_s25 }
 0x1c3   : > { %p1343_p13 = pnand %p1342_p8, %p1562_p12 }
 0x1c4   : > { %p1348_p9 = por %p1347_p0, %p1346_p10 }
 0x1c5   : > { %p1344_p7 = pneg %p1343_p13 }
 0x1c7   : > { %p1349_p3 = pnand %p1348_p9, %p1344_p7 }
 0x1c9   : > { %1352 = shalt.err (!%p1349_p3)
}
 0x1ca   : > { %s1428_s28 = smov 128   ;;  %s1429_s18 = smov 8  }
 0x1cb   : > { %1167 = dma.vmem_to_hbm [thread:$0]  (%p1562_p12), %s1969_s22, 1024, %s1967_s7, %s932_s9, %s1428_s28, %s1428_s28, %s1429_s18  }
 0x1cc PF: > { %s962_s12 = sand.u32 1, %s1395_s15   ;;  %p2042_p11 = scmp.ne.s32.totalorder %s2033_s26, 0 }
 0x1cd   : > { %p2043_p6 = scmp.ge.s32.totalorder %s1415_s20, 2  ;;  %s963_s8 = scalar_lea.sflag [#allocation5], %s962_s12 }
 0x1cf   : > { %p1184_p1 = pnand %p2043_p6, %p2042_p11 }
 0x1d1   : > { %p1185_p5 = pneg %p1184_p1 }
 0x1d3   : > { %1390 = dma.done.wait (%p1185_p5), %s963_s8, 1024  }
 0x1d4   : > { %1392 = vsyncadd (%p1185_p5), %s963_s8, 4294966272  ;;  %s22_s20 = sadd.s32 1, %s1415_s20   ;;  %s2044_s15 = smov %s1399_s16 }
 0x1d5   : > { %p19_p2 = scmp.ge.s32.totalorder %s22_s20, 4   ;;  %s2045_s16 = smov %s1403_s17 }
 0x1d6   : > { %s2046_s17 = smov %s1574_s10  ;;  %s2047_s18 = smov %s1411_s19 }
 0x1d7   : > { %s2048_s19 = smov %s2050_s29  ;;  %21 = sbr.rel (!%p19_p2) target bundleno = 8 (0x8), region = 103 }
 0x1dc   :  { %968 = vsyncpa [#allocation4], 1 }
 0x1dd   :  { %970 = vsyncpa [#allocation4 + $0x1], 1 }
 0x1de   :  { %971 = vsyncpa [#allocation5], 1 }
 0x1df   :  { %973 = vsyncpa [#allocation5 + $0x1], 1 }
 0x1e0   :  { %974 = vsyncpa [#allocation6], 1 }
 0x1e1   :  { %976 = vsyncpa [#allocation6 + $0x1], 1 }
 0x1e2   :  { %977 = vsyncpa [#allocation9], 1 }

</bundles_post_ra>
